<compile_context>
chip_gen: v7x
topology: tpu7x:2x2x1
jax: 0.10.0
libtpu: 0.0.40
codegen_flags: <defaults>
</compile_context>

<pallas_src>
import functools

import numpy as np
import jax
import jax.numpy as jnp
from jax import lax
from jax.experimental import pallas as pl
from jax.experimental.pallas import tpu as pltpu

_LANE = 128


def _round_up(x: int, m: int) -> int:
    return ((x + m - 1) // m) * m


def _cdiv(a: int, b: int) -> int:
    return (a + b - 1) // b


def _adaptive_avg_pool1d_matrix(in_len: int, out_len: int, out_pad: int) -> np.ndarray:
    """Exact F.adaptive_avg_pool1d operator as an (in_len, out_pad) f32 matrix.

    Columns >= out_len are zero padding (sliced off outside the kernel).
    """
    P = np.zeros((in_len, out_pad), dtype=np.float32)
    for j in range(out_len):
        start = (j * in_len) // out_len
        end = -((-(j + 1) * in_len) // out_len)  # ceil((j+1)*L/out)
        P[start:end, j] = 1.0 / float(end - start)
    return P


def _pool_matmul_kernel(x_ref, p_ref, o_ref, *, precision):
    # (tb, L) @ (L, out_pad) on the MXU with f32 accumulation.
    o_ref[...] = jnp.dot(
        x_ref[...],
        p_ref[...],
        preferred_element_type=jnp.float32,
        precision=precision,
    ).astype(o_ref.dtype)


def _vmem_capacity_bytes() -> int:
    """Per-TensorCore VMEM capacity; conservative fallback if the query fails."""
    try:
        info = pltpu.get_tpu_info()
        cap = getattr(info, "vmem_capacity_bytes", None)
        if cap:
            return int(cap)
    except Exception:
        pass
    return 64 << 20  # conservative (v7x per-core VMEM); safe on v5e/v6e too


def _choose_row_tile(n_rows: int, L: int, out_pad: int,
                     x_item: int, out_item: int, p_item: int,
                     budget: int) -> int:
    """Pick the row tile tb.

    Resident VMEM = 2x input tile + 2x output tile + 2x P (Pallas double-buffers
    every input spec, even with a constant index_map) + ~2 MiB Mosaic scratch.
    tb is rounded to MXU-friendly sizes and the grid is kept >= 2 steps when the
    row count allows (so v7x's second TensorCore gets work).
    """
    n_pad = _round_up(max(n_rows, 1), 8)

    p_resident = 2 * L * out_pad * p_item
    avail = budget - p_resident - (2 << 20)
    per_row = 2 * (L * x_item + out_pad * out_item)
    tb = max(avail // max(per_row, 1), 8)
    tb = min(tb, 1024, n_pad)

    # MXU-friendly rounding: 256 (v6e/v7x 2x256^2 MXU) > 128 (v5e 128^2) > 8.
    if tb >= 256:
        tb = (tb // 256) * 256
    elif tb >= 128:
        tb = 128
    else:
        tb = max((tb // 8) * 8, 8)
    tb = min(tb, n_pad)

    # Guarantee >= 2 grid steps when there is enough work: lets the "parallel"
    # row axis shard across v7x's two TensorCores (harmless on v5e/v6e).
    if n_rows > 8 and _cdiv(n_rows, tb) < 2:
        tb = max(_round_up(_cdiv(n_rows, 2), 8), 8)
    return int(tb)


def aggregator_forward(features: jnp.ndarray, target_dim: int, *,
                       activation_dtype=None, precision=None) -> jnp.ndarray:
    """Pallas equivalent of Aggregator.forward.

    features:         (N, ...) array, flattened per-row to length L.
    activation_dtype: optional compute dtype for the activations (e.g.
                      jnp.bfloat16 to halve HBM traffic; accumulation stays f32).
    returns:          (N, target_dim), same dtype as `features`.
    """
    N = features.shape[0]
    x = features.reshape(N, -1)
    L = x.shape[1]
    out_dtype = features.dtype

    if activation_dtype is not None:
        x = x.astype(activation_dtype)
    compute_dtype = x.dtype

    if precision is None:
        # f32 activations: explicit full-precision MXU passes (default f32 dot
        # precision on TPU is not guaranteed full f32). bf16: native MXU path.
        precision = (lax.Precision.HIGHEST
                     if compute_dtype == jnp.float32 else lax.Precision.DEFAULT)

    out_pad = _round_up(target_dim, _LANE)  # lane-dense output / MXU-aligned N
    P = jnp.asarray(_adaptive_avg_pool1d_matrix(L, target_dim, out_pad))
    P = P.astype(compute_dtype)

    x_item = jnp.dtype(compute_dtype).itemsize
    p_item = x_item
    out_item = jnp.dtype(out_dtype).itemsize

    cap = _vmem_capacity_bytes()
    budget = int(cap * 0.7)   # ~45 MiB on v7x (64 MiB), ~90 MiB on v5e/v6e (128 MiB)
    tb = _choose_row_tile(N, L, out_pad, x_item, out_item, p_item, budget)
    grid = (pl.cdiv(N, tb),)

    # 2x double-buffered input tile + 2x output tile + 2x P + Mosaic scratch.
    needed = (2 * tb * L * x_item
              + 2 * tb * out_pad * out_item
              + 2 * L * out_pad * p_item
              + (4 << 20))
    vmem_limit = int(min(int(cap * 0.8), max(needed, 32 << 20)))

    cost = pl.CostEstimate(
        flops=2 * N * L * out_pad,
        transcendentals=0,
        bytes_accessed=N * L * x_item + N * out_pad * out_item + L * out_pad * p_item,
    )

    kernel = functools.partial(_pool_matmul_kernel, precision=precision)

    out = pl.pallas_call(
        kernel,
        out_shape=jax.ShapeDtypeStruct((N, out_pad), out_dtype),
        grid=grid,
        in_specs=[
            # Row-tiled activations: double-buffered across the grid.
            pl.BlockSpec((tb, L), lambda i: (i, 0)),
            # Pooling operator: constant index_map -> DMA'd once, VMEM-resident
            # (its two buffers are counted in the VMEM budget above).
            pl.BlockSpec((L, out_pad), lambda i: (0, 0)),
        ],
        out_specs=pl.BlockSpec((tb, out_pad), lambda i: (i, 0)),
        compiler_params=pltpu.CompilerParams(
            dimension_semantics=("parallel",),
            vmem_limit_bytes=vmem_limit,
        ),
        cost_estimate=cost,
    )(x, P)

    if out_pad != target_dim:
        out = out[:, :target_dim]
    return out


def _reference_forward(features: np.ndarray, target_dim: int) -> np.ndarray:
    """Independent numpy reference mirroring F.adaptive_avg_pool1d semantics."""
    N = features.shape[0]
    x = np.asarray(features, dtype=np.float32).reshape(N, -1)
    L = x.shape[1]
    out = np.zeros((N, target_dim), dtype=np.float32)
    for j in range(target_dim):
        start = (j * L) // target_dim
        end = -((-(j + 1) * L) // target_dim)
        out[:, j] = x[:, start:end].mean(axis=1)
    return out


if __name__ == "__main__":
    key = jax.random.PRNGKey(0)

    # Small but representative PatchCore-style shapes:
    # N patches, 2 feature maps of width 512 -> flattened length L = 1024.
    N, C, D = 16, 2, 512
    features = jax.random.normal(key, (N, C, D), dtype=jnp.float32)

    # 1) f32 path (explicit HIGHEST-precision MXU passes), lane-aligned target_dim.
    td = 128
    out_f32 = jax.block_until_ready(aggregator_forward(features, td))
    ref = _reference_forward(np.asarray(features), td)
    assert out_f32.shape == (N, td), out_f32.shape
    np.testing.assert_allclose(np.asarray(out_f32, dtype=np.float32), ref,
                               rtol=1e-3, atol=1e-3)

    # 2) bf16 activation path (halves HBM reads on v6e/v7x) with a
    #    non-lane-aligned target_dim to exercise the zero-column padding.
    td2 = 96
    out_bf16 = jax.block_until_ready(
        aggregator_forward(features, td2, activation_dtype=jnp.bfloat16))
    ref2 = _reference_forward(np.asarray(features), td2)
    assert out_bf16.shape == (N, td2), out_bf16.shape
    np.testing.assert_allclose(np.asarray(out_bf16, dtype=np.float32), ref2,
                               rtol=3e-2, atol=3e-2)

    print("KERNEL_OK")
</pallas_src>

<mosaic_0001>
module attributes {stable_mosaic.version = 11 : i64} {
  func.func @_pool_matmul_kernel(%arg0: i32, %arg1: memref<8x1024xf32, #tpu.memory_space<vmem>>, %arg2: memref<1024x128xf32, #tpu.memory_space<vmem>>, %arg3: memref<8x128xf32, #tpu.memory_space<vmem>>) attributes {dimension_semantics = [#tpu.dimension_semantics<parallel>], iteration_bounds = array<i64: 2>, scalar_prefetch = 0 : i64, scratch_operands = 0 : i64, tpu.core_type = #tpu.core_type<tc>, window_params = [{transform_indices = @transform_0, window_bounds = array<i64: 8, 1024>}, {pipeline_mode = #tpu.pipeline_mode<synchronous>, transform_indices = @transform_1, window_bounds = array<i64: 1024, 128>}, {transform_indices = @transform_2, window_bounds = array<i64: 8, 128>}]} {
    %c0 = arith.constant 0 : index
    %c0_0 = arith.constant 0 : index
    %0 = vector.load %arg1[%c0, %c0_0] : memref<8x1024xf32, #tpu.memory_space<vmem>>, vector<8x1024xf32>
    %c0_1 = arith.constant 0 : index
    %c0_2 = arith.constant 0 : index
    %1 = vector.load %arg2[%c0_1, %c0_2] : memref<1024x128xf32, #tpu.memory_space<vmem>>, vector<1024x128xf32>
    %cst = arith.constant dense<0.000000e+00> : vector<8x128xf32>
    %2 = tpu.matmul %0, %1, %cst {dimension_numbers = #tpu.dot_dimension_numbers<[1], [0], [0], [1], [0, 0, 1, 1], [], []>, precision = #tpu.contract_precision<fp32>} : vector<8x1024xf32>, vector<1024x128xf32>, vector<8x128xf32> -> vector<8x128xf32>
    %c0_3 = arith.constant 0 : index
    %c0_4 = arith.constant 0 : index
    %3 = vector.load %arg3[%c0_3, %c0_4] : memref<8x128xf32, #tpu.memory_space<vmem>>, vector<8x128xf32>
    tpu.vector_store %arg3[%c0_3, %c0_4], %2 {strides = array<i32>} : memref<8x128xf32, #tpu.memory_space<vmem>>, vector<8x128xf32>,
    return
  }
  func.func @transform_0(%arg0: i32) -> (i32, i32) {
    %c0_i32 = arith.constant 0 : i32
    %c0_i32_0 = arith.constant 0 : i32
    return %arg0, %c0_i32 : i32, i32
  }
  func.func @transform_1(%arg0: i32) -> (i32, i32) {
    %c0_i32 = arith.constant 0 : i32
    %c0_i32_0 = arith.constant 0 : i32
    %c0_i32_1 = arith.constant 0 : i32
    return %c0_i32, %c0_i32_0 : i32, i32
  }
  func.func @transform_2(%arg0: i32) -> (i32, i32) {
    %c0_i32 = arith.constant 0 : i32
    %c0_i32_0 = arith.constant 0 : i32
    return %arg0, %c0_i32 : i32, i32
  }
}

</mosaic_0001>

<bundles_post_ra>
// kernel: tpu_custom_call.1
= control target key start
LH: loop header
LB: loop body
LE: loop exit
PB: predicated region body
PF: predicated region fallthrough
CT: control target
= control target key end

     0   :  { %7 = vsyncpa [#allocation3], 0  ;;  %s7718_s0 = inlined_call_operand.hbm [shape: f32[16,1024], index: 0, kind: input, shape index: {}]   ;;  %s7719_s1 = inlined_call_operand.hbm [shape: f32[1024,128], index: 1, kind: input, shape index: {}]   ;;  %s7720_s2 = inlined_call_operand.hbm [shape: f32[16,128], index: 2, kind: output, shape index: {}]  }
   0x1   :  { %9 = vsyncpa [#allocation3 + $0x1], 0 }
   0x2   :  { %10 = vsyncpa [#allocation6], 0 }
   0x3   :  { %11 = vsyncpa [#allocation4], 0 }
   0x4   :  { %13 = vsyncpa [#allocation4 + $0x1], 0  ;;  %s5687_s9 = smov 0   ;;  %s5689_s10 = smov 0  }
   0x5   :  { %s5691_s11 = smov 0   ;;  %s5693_s12 = smov 0  }
   0x6 LB: > { %s5708_s13 = sadd.s32 4294967295, %s5665_s12   ;;  %s3854_s14 = sadd.s32 4294967294, %s5665_s12   ;;  %s5665_s12 = sphi %s5693_s12, %s8188_s12   ;;  %s5661_s11 = sphi %s5691_s11, %s8187_s11   ;;  %s5657_s10 = sphi %s5689_s10, %s8186_s10   ;;  %s5653_s9 = sphi %s5687_s9, %s8185_s9  }
   0x7   : > { %p39_p0 = scmp.ne.s32.totalorder %s5657_s10, %s5653_s9  ;;  %p7721_p1 = scmp.eq.s32.totalorder %s5708_s13, 0 }
   0x8   : > { %p90_p3 = scmp.eq.s32.totalorder %s3854_s14, 1  ;;  %p3855_p5 = scmp.ge.s32.totalorder %s5665_s12, 1 }
   0x9   : > { %p5717_p4 = por %p7721_p1, %p39_p0  ;;  %p97_p7 = scmp.lt.s32.totalorder %s5665_s12, 3 }
   0xa   : > { %p5722_p6 = por %p90_p3, %p39_p0  ;;  %s5667_s18 = smov [#allocation5]  }
   0xb   : > { %s7914_s15 = scalar_select %p5717_p4, 1, 0 }
   0xc   : > { %s7915_s16 = scalar_select %p5722_p6, 1, 0 }
   0xd   : > { %p5727_p8 = pnand %p3855_p5, %p97_p7  ;;  %s109_s19 = sshll.u32 %s5667_s18, 4  ;;  %s5731_s19 = int_to_ptr.vmem [resolvable:$true] %s109_s19 }
   0xe   : > { %s5743_s21 = sadd.s32 1, %s5665_s12   ;;  %s26_s22 = sadd.s32 1, %s5661_s11 }
   0xf   : > { %s7916_s17 = scalar_select %p5727_p8, 1, 0 }
  0x10   : > { %p5486_p9 = pneg %p5727_p8  ;;  %s23_s23 = ssub.s32 %s5665_s12, %s5743_s21 }
  0x11   : > { %s5537_s26 = scalar_lea.hbm %s7719_s1, 16384 }
  0x12   : > { %p5738_p11 = pnand %p5486_p9, %p7721_p1  ;;  %p5538_p12 = scmp.ne.s32.totalorder %s7719_s1, %s5537_s26 }
  0x13   : > { %p5544_p5 = scmp.lt.u32.totalorder %s5537_s26, %s7719_s1 }
  0x14   : > { %p5539_p13 = pneg %p5738_p11 }
  0x16   : > { %p5540_p0 = pnand %p5539_p13, %p5538_p12 }
  0x18   : > { %p5541_p3 = pneg %p5540_p0 }
  0x1a   : > { %p5546_p7 = pnand %p5544_p5, %p5541_p3 }
  0x1c   : > { %5549 = shalt.err (!%p5546_p7)
}
  0x1d   : > { %s5550_s3 = scalar_lea.vmem %s5731_s19, 16384  ;;  %p5558_p2 = scmp.lt.s32.totalorder %s5731_s19, %s5731_s19 }
  0x1e   : > { %p5551_p9 = scmp.ne.s32.totalorder %s5731_s19, %s5550_s3  ;;  %p5559_p6 = scmp.lt.s32.totalorder %s5550_s3, %s5550_s3 }
  0x20   : > { %p5553_p10 = pnand %p5551_p9, %p5539_p13  ;;  %p5560_p4 = por %p5559_p6, %p5558_p2 }
  0x22   : > { %p5554_p1 = pneg %p5553_p10 }
  0x24   : > { %p5561_p8 = pnand %p5560_p4, %p5554_p1 }
  0x26   : > { %5564 = shalt.err (!%p5561_p8)
}
  0x27   : > { %s5668_s4 = smov 128   ;;  %s5669_s5 = smov 8  }
  0x28   : > { %5489 = dma.hbm_to_vmem [thread:$0]  (!%p5738_p11), %s7719_s1, 16384, %s5731_s19, [#allocation6], %s5668_s4, %s5668_s4, %s5669_s5  }
  0x29   : > { %p24_p2 = scmp.eq.s32.totalorder %s23_s23, 0  ;;  %p33_p1 = scmp.ne.s32.totalorder %s5661_s11, %s5657_s10 }
  0x2a   : > { %p34_p4 = scmp.eq.s32.totalorder %s5665_s12, 0  ;;  %p5499_p6 = scmp.lt.s32.totalorder %s5665_s12, 2 }
  0x2b   : > { %s5774_s8 = scalar_select %p24_p2, %s5661_s11, %s26_s22  }
  0x2c   : > { %p35_p8 = por %p34_p4, %p33_p1  ;;  %p7918_p10 = scmp.eq.s32.totalorder %s5708_s13, 1 }
  0x2d   : > { %s123_s18 = sand.u32 1, %s5661_s11   ;;  %s3869_s24 = sshll.u32 %s5665_s12, 10 }
  0x2e   : > { %p5778_p12 = por %p7918_p10, %p33_p1  ;;  %s3858_s25 = sshll.u32 %s123_s18, 6 }
  0x2f   : > { %s5787_s27 = scalar_lea.hbm %s7718_s0, %s3869_s24  ;;  %s127_s19 = scalar_lea.vmem [#allocation2], %s3858_s25 }
  0x30   : > { %s135_s22 = sshll.u32 %s127_s19, 4  ;;  %p5789_p11 = pnand %p5499_p6, %p35_p8  ;;  %s5793_s22 = int_to_ptr.vmem [resolvable:$true] %s135_s22 }
  0x31   : > { %s124_s28 = scalar_lea.sflag [#allocation3], %s123_s18  ;;  %s5565_s29 = scalar_lea.hbm %s5787_s27, 1024 }
  0x32   : > { %p5566_p13 = scmp.ne.s32.totalorder %s5787_s27, %s5565_s29  ;;  %p5567_p0 = pneg %p5789_p11 }
  0x33   : > { %s5570_s4 = scalar_lea.hbm %s7718_s0, 2048  ;;  %p5571_p7 = scmp.lt.u32.totalorder %s5787_s27, %s7718_s0 }
  0x34   : > { %p5568_p3 = pnand %p5567_p0, %p5566_p13  ;;  %p5572_p9 = scmp.lt.u32.totalorder %s5570_s4, %s5565_s29 }
  0x35   : > { %p5574_p1 = scmp.lt.u32.totalorder %s5565_s29, %s5787_s27 }
  0x36   : > { %p5569_p5 = pneg %p5568_p3  ;;  %p5573_p2 = por %p5572_p9, %p5571_p7 }
  0x38   : > { %p5575_p4 = por %p5574_p1, %p5573_p2 }
  0x3a   : > { %p5576_p6 = pnand %p5575_p4, %p5569_p5 }
  0x3c   : > { %5579 = shalt.err (!%p5576_p6)
}
  0x3d   : > { %s5580_s7 = scalar_lea.vmem %s5793_s22, 1024  ;;  %s5670_s18 = smov [#allocation2]  }
  0x3e   : > { %p5581_p8 = scmp.ne.s32.totalorder %s5793_s22, %s5580_s7  ;;  %s5585_s24 = sshll.u32 %s5670_s18, 4  ;;  %s5586_s24 = int_to_ptr.vmem [resolvable:$false] %s5585_s24 }
  0x3f   : > { %s5587_s25 = scalar_lea.vmem %s5586_s24, 2048  ;;  %p5588_p3 = scmp.lt.s32.totalorder %s5793_s22, %s5586_s24 }
  0x40   : > { %p5583_p10 = pnand %p5581_p8, %p5567_p0  ;;  %p5589_p7 = scmp.lt.s32.totalorder %s5587_s25, %s5580_s7 }
  0x42   : > { %p5584_p13 = pneg %p5583_p10  ;;  %p5590_p9 = por %p5589_p7, %p5588_p3 }
  0x44   : > { %p5591_p2 = pnand %p5590_p9, %p5584_p13 }
  0x46   : > { %5594 = shalt.err (!%p5591_p2)
}
  0x47   : > { %5493 = dma.hbm_to_vmem [thread:$0]  (!%p5789_p11), %s5787_s27, 1024, %s5793_s22, %s124_s28  }
  0x48   : > { %p7921_p5 = scmp.ne.s32.totalorder %s7916_s17, 0 }
  0x4a   : > { %144 = sbr.rel (%p7921_p5) target bundleno = 732 (0x2dc), region = 28 }
  0x51   : > { %s5823_s20 = sand.u32 1, %s5657_s10   ;;  %p7922_p0 = scmp.ne.s32.totalorder %s7914_s15, 0 }
  0x52   : > { %s3862_s26 = sshll.u32 %s5823_s20, 6  ;;  %s147_s19 = scalar_lea.sflag [#allocation3], %s5823_s20 }
  0x53   : > { %s5827_s29 = scalar_lea.vmem [#allocation2], %s3862_s26 }
  0x54   : > { %5640 = dma.done.wait (%p7922_p0), %s147_s19, 1024  }
  0x55   : > { %5642 = vsyncadd (%p7922_p0), %s147_s19, 4294966272  ;;  %p7923_p11 = scmp.eq.s32.totalorder %s5708_s13, 0 }
  0x57   : > { %5644 = dma.done.wait (%p7923_p11), [#allocation6], 16384   ;;  %p7924_p1 = pmov %p7923_p11 }
  0x58   : > { %v199_v0 = vld [vmem:[#allocation5 + $0x80] sm:$0xff]  ;;  %v200_v1 = vld [vmem:[#allocation5 + $0x88] sm:$0xff]  ;;  %v201_v7 = vld [vmem:[#allocation5 + $0x90] sm:$0xff]  ;;  %s3864_s15 = sshll.u32 %s5823_s20, 3  ;;  %s3866_s17 = sshll.u32 %s5708_s13, 7 }
  0x59   : > { %5646 = vsyncadd (%p7924_p1), [#allocation6], 4294950912  ;;  %v183_v2 = vld [vmem:[#allocation5] sm:$0xff]  ;;  %v360_v3 = vand.u32 4294901760, %v199_v0  ;;  %v363_v4 = vand.u32 4294901760, %v200_v1  ;;  %v184_v5 = vld [vmem:[#allocation5 + $0x8] sm:$0xff]  ;;  %s7674_s30 = scalar_lea.hbm %s7720_s2, %s3866_s17 }
  0x5a   : > { %v312_v6 = vand.u32 4294901760, %v183_v2  ;;  %v202_v8 = vld [vmem:[#allocation5 + $0x98] sm:$0xff]  ;;  %v315_v9 = vand.u32 4294901760, %v184_v5  ;;  %v366_v10 = vand.u32 4294901760, %v201_v7  ;;  %v185_v12 = vld [vmem:[#allocation5 + $0x10] sm:$0xff]  ;;  %v203_v18 = vld [vmem:[#allocation5 + $0xa0] sm:$0xff] }
  0x5b   : > { %v369_v11 = vand.u32 4294901760, %v202_v8  ;;  %v186_v13 = vld [vmem:[#allocation5 + $0x18] sm:$0xff]  ;;  %v5837_v14 = vpack.c.bf16 %v363_v4, %v360_v3  ;;  %v318_v16 = vand.u32 4294901760, %v185_v12  ;;  %v204_v19 = vld [vmem:[#allocation5 + $0xa8] sm:$0xff]  ;;  %v187_v23 = vld [vmem:[#allocation5 + $0x20] sm:$0xff]  ;;  %v372_v29 = vand.u32 4294901760, %v203_v18 }
  0x5c   : > { %v5839_v15 = vsub.f32 %v183_v2, %v312_v6  ;;  %v321_v17 = vand.u32 4294901760, %v186_v13  ;;  %v5841_v20 = vpack.c.bf16 %v315_v9, %v312_v6  ;;  %v5843_v21 = vsub.f32 %v184_v5, %v315_v9  ;;  %v188_v24 = vld [vmem:[#allocation5 + $0x28] sm:$0xff]  ;;  %v205_v37 = vld [vmem:[#allocation5 + $0xb0] sm:$0xff]  ;;  %v206_v42 = vld [vmem:[#allocation5 + $0xb8] sm:$0xff]  ;;  %s174_s27 = scalar_lea.vmem [#allocation7], %s3864_s15  ;;  %s3761_s3 = scalar_lea.sflag [#allocation4], %s5823_s20 }
  0x5d   : > { %v5845_v22 = vpack.c.bf16 %v369_v11, %v366_v10  ;;  %4711 = vmatprep.subr.bf16.mxu0 %v5837_v14  ;;  %v5848_v25 = vsub.f32 %v201_v7, %v366_v10  ;;  %v5850_v26 = vsub.f32 %v202_v8, %v369_v11  ;;  %v5854_v28 = vsub.f32 %v185_v12, %v318_v16  ;;  %v189_v55 = vld [vmem:[#allocation5 + $0x30] sm:$0xff]  ;;  %v190_v56 = vld [vmem:[#allocation5 + $0x38] sm:$0xff]  ;;  %v207_v5 = vld [vmem:[#allocation5 + $0xc0] sm:$0xff]  ;;  %s3774_s22 = sshll.u32 %s174_s27, 4  ;;  %s5671_s13 = smov [#allocation7]   ;;  %s7676_s22 = int_to_ptr.vmem [resolvable:$true] %s3774_s22 }
  0x5e   : > { %v5852_v27 = vpack.c.bf16 %v321_v17, %v318_v16  ;;  %4713 = vmatpush3.bf16.msra.mxu0 %v5841_v20  ;;  %v375_v30 = vand.u32 4294901760, %v204_v19  ;;  %v5857_v31 = vsub.f32 %v199_v0, %v360_v3  ;;  %v5859_v32 = vsub.f32 %v200_v1, %v363_v4  ;;  %v208_v6 = vld [vmem:[#allocation5 + $0xc8] sm:$0xff]  ;;  %v191_v11 = vld [vmem:[#allocation5 + $0x40] sm:$0xff]  ;;  %s5595_s4 = scalar_lea.vmem %s7676_s22, 128  ;;  %s5599_s5 = sshll.u32 %s5671_s13, 4  ;;  %s5600_s5 = int_to_ptr.vmem [resolvable:$false] %s5599_s5 }
  0x5f   : > { %4715 = vmatprep.subr.bf16.mxu0 %v5845_v22  ;;  %v324_v33 = vand.u32 4294901760, %v187_v23  ;;  %v327_v34 = vand.u32 4294901760, %v188_v24  ;;  %v7740_v35 = vand.u32 4294901760, %v5839_v15  ;;  %v7738_v36 = vand.u32 4294901760, %v5843_v21  ;;  %p5596_p4 = scmp.ne.s32.totalorder %s7676_s22, %s5595_s4  ;;  %s5601_s6 = scalar_lea.vmem %s5600_s5, 256 }
  0x60   : > { %v5864_v38 = vsub.f32 %v186_v13, %v321_v17  ;;  %v5866_v39 = vpack.c.bf16 %v375_v30, %v372_v29  ;;  %v5868_v40 = vsub.f32 %v203_v18, %v372_v29  ;;  %v7743_v41 = vand.u32 4294901760, %v5857_v31  ;;  %v192_v29 = vld [vmem:[#allocation5 + $0x48] sm:$0xff]  ;;  %p5602_p10 = scmp.lt.s32.totalorder %s7676_s22, %s5600_s5  ;;  %p5603_p13 = scmp.lt.s32.totalorder %s5601_s6, %s5595_s4 }
  0x61   : > { %v5871_v43 = vsub.f32 %v204_v19, %v375_v30  ;;  %v7742_v44 = vand.u32 4294901760, %v5859_v32  ;;  %v5874_v45 = vpack.c.bf16 %v327_v34, %v324_v33  ;;  %v5876_v46 = vsub.f32 %v187_v23, %v324_v33  ;;  %p5597_p6 = pnand %p5596_p4, %p5778_p12 }
  0x62   : > { %4717 = vmatpush3.bf16.msra.mxu0 %v5852_v27  ;;  %v539_v47 = vsub.f32 %v5857_v31, %v7743_v41  ;;  %v427_v48 = vsub.f32 %v5839_v15, %v7740_v35  ;;  %v434_v49 = vsub.f32 %v5843_v21, %v7738_v36  ;;  %v378_v50 = vand.u32 4294901760, %v205_v37  ;;  %v176_v41 = vld [vmem:[%s5827_s29 + $0x8] sm:$0xff]  ;;  %p5604_p3 = por %p5603_p13, %p5602_p10 }
  0x63   : > { %4719 = vmatprep.subr.bf16.mxu0 %v5866_v39  ;;  %v546_v51 = vsub.f32 %v5859_v32, %v7742_v44  ;;  %v381_v52 = vand.u32 4294901760, %v206_v42  ;;  %v7736_v53 = vand.u32 4294901760, %v5848_v25  ;;  %v7734_v54 = vand.u32 4294901760, %v5850_v26  ;;  %p5598_p8 = pneg %p5597_p6 }
  0x64   : > { %v540_v57 = vand.u32 4294901760, %v539_v47  ;;  %v5894_v58 = vsub.f32 %v188_v24, %v327_v34  ;;  %v428_v59 = vand.u32 4294901760, %v427_v48  ;;  %v435_v60 = vand.u32 4294901760, %v434_v49 }
  0x65   : > { %v547_v61 = vand.u32 4294901760, %v546_v51  ;;  %v5896_v62 = vpack.c.bf16 %v381_v52, %v378_v50  ;;  %v5898_v63 = vsub.f32 %v205_v37, %v378_v50  ;;  %v553_v0 = vsub.f32 %v5848_v25, %v7736_v53  ;;  %p5605_p7 = pnand %p5604_p3, %p5598_p8 }
  0x66   : > { %4721 = vmatpush3.bf16.msra.mxu0 %v5874_v45  ;;  %v4744_v1 = vpack.c.bf16 %v435_v60, %v428_v59  ;;  %v560_v2 = vsub.f32 %v5850_v26, %v7734_v54  ;;  %v330_v3 = vand.u32 4294901760, %v189_v55  ;;  %v333_v4 = vand.u32 4294901760, %v190_v56  ;;  %v210_v59 = vld [vmem:[#allocation5 + $0xd8] sm:$0xff] }
  0x67   : > { %v4742_v7 = vpack.c.bf16 %v547_v61, %v540_v57  ;;  %4723 = vmatprep.subr.bf16.mxu0 %v5896_v62  ;;  %v554_v8 = vand.u32 4294901760, %v553_v0  ;;  %v7733_v9 = vand.u32 4294901760, %v5854_v28  ;;  %v7731_v10 = vand.u32 4294901760, %v5864_v38  ;;  %v209_v57 = vld [vmem:[#allocation5 + $0xd0] sm:$0xff]  ;;  %v214_v54 = vld [vmem:[#allocation5 + $0xf8] sm:$0xff] }
  0x68   : > { %v5910_v12 = vsub.f32 %v206_v42, %v381_v52  ;;  %v561_v13 = vand.u32 4294901760, %v560_v2  ;;  %v5912_v16 = vpack.c.bf16 %v333_v4, %v330_v3  ;;  %v5914_v17 = vsub.f32 %v189_v55, %v330_v3 }
  0x69   : > { %4743 = vmatprep.subr.bf16.mxu1 %v4742_v7  ;;  %v441_v18 = vsub.f32 %v5854_v28, %v7733_v9  ;;  %v448_v19 = vsub.f32 %v5864_v38, %v7731_v10  ;;  %v384_v23 = vand.u32 4294901760, %v207_v5  ;;  %v387_v24 = vand.u32 4294901760, %v208_v6  ;;  %v213_v9 = vld [vmem:[#allocation5 + $0xf0] sm:$0xff] }
  0x6a   : > { %4745 = vmatpush3.bf16.msra.mxu1 %v4744_v1  ;;  %v4746_v30 = vpack.c.bf16 %v561_v13, %v554_v8  ;;  %4725 = vmatpush3.bf16.msra.mxu0 %v5912_v16  ;;  %v7729_v33 = vand.u32 4294901760, %v5868_v40  ;;  %v7728_v34 = vand.u32 4294901760, %v5871_v43  ;;  %v336_v37 = vand.u32 4294901760, %v191_v11  ;;  %v193_v1 = vld [vmem:[#allocation5 + $0x50] sm:$0xff] }
  0x6b   : > { %v5925_v42 = vsub.f32 %v190_v56, %v333_v4  ;;  %v442_v47 = vand.u32 4294901760, %v441_v18  ;;  %v449_v48 = vand.u32 4294901760, %v448_v19  ;;  %v5927_v49 = vpack.c.bf16 %v387_v24, %v384_v23  ;;  %v194_v18 = vld [vmem:[#allocation5 + $0x58] sm:$0xff] }
  0x6c   : > { %4747 = vmatprep.subr.bf16.mxu1 %v4746_v30  ;;  %v5929_v50 = vsub.f32 %v207_v5, %v384_v23  ;;  %v567_v51 = vsub.f32 %v5868_v40, %v7729_v33  ;;  %v574_v52 = vsub.f32 %v5871_v43, %v7728_v34  ;;  %v339_v55 = vand.u32 4294901760, %v192_v29 }
  0x6d   : > { %v4748_v56 = vpack.c.bf16 %v449_v48, %v442_v47  ;;  %4727 = vmatprep.subr.bf16.mxu0 %v5927_v49  ;;  %v5938_v60 = vsub.f32 %v208_v6, %v387_v24  ;;  %v7726_v61 = vand.u32 4294901760, %v5876_v46  ;;  %v7724_v0 = vand.u32 4294901760, %v5894_v58 }
  0x6e   : > { %v568_v2 = vand.u32 4294901760, %v567_v51  ;;  %v575_v3 = vand.u32 4294901760, %v574_v52  ;;  %v5942_v4 = vpack.c.bf16 %v339_v55, %v336_v37  ;;  %v5944_v5 = vsub.f32 %v191_v11, %v336_v37 }
  0x6f   : > { %4749 = vmatpush3.bf16.msra.mxu1 %v4748_v56  ;;  %v455_v7 = vsub.f32 %v5876_v46, %v7726_v61  ;;  %v462_v6 = vsub.f32 %v5894_v58, %v7724_v0  ;;  %v390_v8 = vand.u32 4294901760, %v209_v57  ;;  %v393_v13 = vand.u32 4294901760, %v210_v59  ;;  %v212_v0 = vld [vmem:[#allocation5 + $0xe8] sm:$0xff] }
  0x70   : > { %v4750_v19 = vpack.c.bf16 %v575_v3, %v568_v2  ;;  %4729 = vmatpush3.bf16.msra.mxu0 %v5942_v4  ;;  %v7725_v23 = vand.u32 4294901760, %v5898_v63  ;;  %v7727_v11 = vand.u32 4294901760, %v5910_v12  ;;  %v342_v24 = vand.u32 4294901760, %v193_v1  ;;  %v211_v3 = vld [vmem:[#allocation5 + $0xe0] sm:$0xff] }
  0x71   : > { %v5955_v30 = vsub.f32 %v192_v29, %v339_v55  ;;  %v456_v37 = vand.u32 4294901760, %v455_v7  ;;  %v463_v47 = vand.u32 4294901760, %v462_v6  ;;  %v5957_v48 = vpack.c.bf16 %v393_v13, %v390_v8  ;;  %v195_v6 = vld [vmem:[#allocation5 + $0x60] sm:$0xff] }
  0x72   : > { %4751 = vmatprep.subr.bf16.mxu1 %v4750_v19  ;;  %v5959_v51 = vsub.f32 %v209_v57, %v390_v8  ;;  %v581_v52 = vsub.f32 %v5898_v63, %v7725_v23  ;;  %v588_v56 = vsub.f32 %v5910_v12, %v7727_v11  ;;  %v345_v2 = vand.u32 4294901760, %v194_v18  ;;  %v196_v11 = vld [vmem:[#allocation5 + $0x68] sm:$0xff] }
  0x73   : > { %v4752_v29 = vpack.c.bf16 %v463_v47, %v456_v37  ;;  %4731 = vmatprep.subr.bf16.mxu0 %v5957_v48  ;;  %v5968_v55 = vsub.f32 %v210_v59, %v393_v13  ;;  %v7730_v7 = vand.u32 4294901760, %v5914_v17  ;;  %v7732_v57 = vand.u32 4294901760, %v5925_v42 }
  0x74   : > { %v582_v8 = vand.u32 4294901760, %v581_v52  ;;  %v589_v19 = vand.u32 4294901760, %v588_v56  ;;  %v5972_v23 = vpack.c.bf16 %v345_v2, %v342_v24  ;;  %v5974_v61 = vsub.f32 %v193_v1, %v342_v24 }
  0x75   : > { %4753 = vmatpush3.bf16.msra.mxu1 %v4752_v29  ;;  %v469_v37 = vsub.f32 %v5914_v17, %v7730_v7  ;;  %v476_v59 = vsub.f32 %v5925_v42, %v7732_v57  ;;  %v396_v13 = vand.u32 4294901760, %v211_v3  ;;  %v399_v47 = vand.u32 4294901760, %v212_v0 }
  0x76   : > { %7925 = vst [vmem:[#allocation11_spill] sm:$0xff] %v5972_v23  ;;  %v4754_v34 = vpack.c.bf16 %v589_v19, %v582_v8  ;;  %4733 = vmatpush3.bf16.msra.mxu0 %v5972_v23  ;;  %v7735_v52 = vand.u32 4294901760, %v5929_v50  ;;  %v7737_v1 = vand.u32 4294901760, %v5938_v60  ;;  %v348_v24 = vand.u32 4294901760, %v195_v6 }
  0x77   : > { %v5985_v56 = vsub.f32 %v194_v18, %v345_v2  ;;  %v470_v29 = vand.u32 4294901760, %v469_v37  ;;  %v477_v33 = vand.u32 4294901760, %v476_v59  ;;  %v5987_v7 = vpack.c.bf16 %v399_v47, %v396_v13  ;;  %v197_v37 = vld [vmem:[#allocation5 + $0x70] sm:$0xff] }
  0x78   : > { %4755 = vmatprep.subr.bf16.mxu1 %v4754_v34  ;;  %v5989_v10 = vsub.f32 %v211_v3, %v396_v13  ;;  %v595_v8 = vsub.f32 %v5929_v50, %v7735_v52  ;;  %v602_v19 = vsub.f32 %v5938_v60, %v7737_v1  ;;  %v351_v57 = vand.u32 4294901760, %v196_v11  ;;  %v198_v1 = vld [vmem:[#allocation5 + $0x78] sm:$0xff] }
  0x79   : > { %7926 = vst [vmem:[#allocation12_spill] sm:$0xff] %v5987_v7  ;;  %v4756_v18 = vpack.c.bf16 %v477_v33, %v470_v29  ;;  %4735 = vmatprep.subr.bf16.mxu0 %v5987_v7  ;;  %v5998_v2 = vsub.f32 %v212_v0, %v399_v47  ;;  %v7739_v34 = vand.u32 4294901760, %v5944_v5  ;;  %v7741_v3 = vand.u32 4294901760, %v5955_v30 }
  0x7a   : > { %v596_v59 = vand.u32 4294901760, %v595_v8  ;;  %v603_v13 = vand.u32 4294901760, %v602_v19  ;;  %v6002_v52 = vpack.c.bf16 %v351_v57, %v348_v24  ;;  %v6004_v53 = vsub.f32 %v195_v6, %v348_v24 }
  0x7b   : > { %4757 = vmatpush3.bf16.msra.mxu1 %v4756_v18  ;;  %v483_v33 = vsub.f32 %v5944_v5, %v7739_v34  ;;  %v490_v0 = vsub.f32 %v5955_v30, %v7741_v3  ;;  %v402_v47 = vand.u32 4294901760, %v213_v9  ;;  %v405_v29 = vand.u32 4294901760, %v214_v54 }
  0x7c   : > { %7927 = vst [vmem:[#allocation13_spill] sm:$0xff] %v6002_v52  ;;  %v4758_v36 = vpack.c.bf16 %v603_v13, %v596_v59  ;;  %4737 = vmatpush3.bf16.msra.mxu0 %v6002_v52  ;;  %v7746_v8 = vand.u32 4294901760, %v5959_v51  ;;  %v7747_v6 = vand.u32 4294901760, %v5968_v55  ;;  %v354_v24 = vand.u32 4294901760, %v197_v37 }
  0x7d   : > { %v6015_v19 = vsub.f32 %v196_v11, %v351_v57  ;;  %v484_v18 = vand.u32 4294901760, %v483_v33  ;;  %v491_v34 = vand.u32 4294901760, %v490_v0  ;;  %v6017_v35 = vpack.c.bf16 %v405_v29, %v402_v47 }
  0x7e   : > { %4759 = vmatprep.subr.bf16.mxu1 %v4758_v36  ;;  %v6019_v3 = vsub.f32 %v213_v9, %v402_v47  ;;  %v609_v59 = vsub.f32 %v5959_v51, %v7746_v8  ;;  %v616_v13 = vsub.f32 %v5968_v55, %v7747_v6  ;;  %v357_v44 = vand.u32 4294901760, %v198_v1  ;;  %v175_v9 = vld [vmem:[%s5827_s29] sm:$0xff] }
  0x7f   : > { %7928 = vst [vmem:[#allocation14_spill] sm:$0xff] %v6017_v35  ;;  %v4760_v52 = vpack.c.bf16 %v491_v34, %v484_v18  ;;  %4739 = vmatprep.subr.bf16.mxu0 %v6017_v35  ;;  %v6029_v11 = vsub.f32 %v214_v54, %v405_v29  ;;  %v7748_v57 = vand.u32 4294901760, %v5974_v61  ;;  %v7749_v36 = vand.u32 4294901760, %v5985_v56 }
  0x80   : > { %v610_v33 = vand.u32 4294901760, %v609_v59  ;;  %v617_v0 = vand.u32 4294901760, %v616_v13  ;;  %v6034_v47 = vpack.c.bf16 %v357_v44, %v354_v24  ;;  %v6036_v8 = vsub.f32 %v197_v37, %v354_v24 }
  0x81   : > { %4761 = vmatpush3.bf16.msra.mxu1 %v4760_v52  ;;  %v497_v34 = vsub.f32 %v5974_v61, %v7748_v57  ;;  %v504_v54 = vsub.f32 %v5985_v56, %v7749_v36  ;;  %v6044_v29 = vand.u32 4294901760, %v176_v41  ;;  %v7752_v18 = vand.u32 4294901760, %v5989_v10 }
  0x82   : > { %7929 = vst [vmem:[#allocation15_spill] sm:$0xff] %v6034_v47  ;;  %v4762_v6 = vpack.c.bf16 %v617_v0, %v610_v33  ;;  %4741 = vmatpush3.bf16.msra.mxu0 %v6034_v47  ;;  %v7758_v59 = vand.u32 4294901760, %v5998_v2  ;;  %v4774_v52 = vpack.c.bf16 %v5859_v32, %v5857_v31  ;;  %v6051_v37 = vand.u32 4294901760, %v175_v9 }
  0x83   : > { %7930 = vst [vmem:[#allocation16_spill] sm:$0xff] %v6044_v29  ;;  %v498_v24 = vand.u32 4294901760, %v497_v34  ;;  %v505_v13 = vand.u32 4294901760, %v504_v54  ;;  %v6054_v57 = vsub.f32 %v176_v41, %v6044_v29  ;;  %v623_v36 = vsub.f32 %v5989_v10, %v7752_v18  ;;  %648 = vmatprep.mubr.f32.mxu1 %v6044_v29 }
  0x84   : > { %4763 = vmatprep.subr.bf16.mxu1 %v4762_v6  ;;  %v630_v33 = vsub.f32 %v5998_v2, %v7758_v59  ;;  %4775 = vmatprep.subr.bf16.mxu0 %v4774_v52  ;;  %v6064_v0 = vsub.f32 %v175_v9, %v6051_v37  ;;  %v7757_v34 = vand.u32 4294901760, %v6004_v53  ;;  %v7759_v41 = vand.u32 4294901760, %v6015_v19 }
  0x85   : > { %v6068_v54 = vsub.f32 %v198_v1, %v357_v44  ;;  %v4764_v47 = vpack.c.bf16 %v505_v13, %v498_v24  ;;  %v7760_v18 = vand.u32 4294901760, %v6054_v57  ;;  %v624_v35 = vand.u32 4294901760, %v623_v36 }
  0x86   : > { %v631_v29 = vand.u32 4294901760, %v630_v33  ;;  %v415_v6 = vand.u32 4294901760, %v6064_v0  ;;  %v511_v52 = vsub.f32 %v6004_v53, %v7757_v34  ;;  %v518_v9 = vsub.f32 %v6015_v19, %v7759_v41 }
  0x87   : > { %4765 = vmatpush3.bf16.msra.mxu1 %v4764_v47  ;;  %v410_v44 = vsub.f32 %v6054_v57, %v7760_v18  ;;  %v4776_v1 = vpack.c.bf16 %v5843_v21, %v5839_v15  ;;  %v7765_v36 = vand.u32 4294901760, %v6019_v3  ;;  %v7768_v24 = vand.u32 4294901760, %v6029_v11 }
  0x88   : > { %v4766_v13 = vpack.c.bf16 %v631_v29, %v624_v35  ;;  %v416_v33 = vsub.f32 %v6064_v0, %v415_v6  ;;  %v512_v34 = vand.u32 4294901760, %v511_v52  ;;  %v519_v59 = vand.u32 4294901760, %v518_v9 }
  0x89   : > { %v411_v41 = vand.u32 4294901760, %v410_v44  ;;  %v637_v47 = vsub.f32 %v6019_v3, %v7765_v36  ;;  %v644_v18 = vsub.f32 %v6029_v11, %v7768_v24  ;;  %v7767_v7 = vand.u32 4294901760, %v6036_v8 }
  0x8a   : > { %4767 = vmatprep.subr.bf16.mxu1 %v4766_v13  ;;  %v417_v23 = vand.u32 4294901760, %v416_v33  ;;  %v4768_v35 = vpack.c.bf16 %v519_v59, %v512_v34  ;;  %v4778_v29 = vpack.c.bf16 %v5850_v26, %v5848_v25  ;;  %v7766_v52 = vand.u32 4294901760, %v6068_v54 }
  0x8b   : > { %412 = vmatprep.mubr.f32.mxu0 %v411_v41  ;;  %v638_v9 = vand.u32 4294901760, %v637_v47  ;;  %v645_v44 = vand.u32 4294901760, %v644_v18  ;;  %v525_v36 = vsub.f32 %v6036_v8, %v7767_v7  ;;  %v4780_v33 = vpack.c.bf16 %v5864_v38, %v5854_v28 }
  0x8c   : > { %418 = vmatmul.mubr.f32.vlgmr.msra.gmra.mrb[0].mxu0 %v417_v23  ;;  %4769 = vmatpush3.bf16.msra.mxu1 %v4768_v35  ;;  %v532_v13 = vsub.f32 %v6068_v54, %v7766_v52  ;;  %v4782_v41 = vpack.c.bf16 %v5871_v43, %v5868_v40  ;;  %v4784_v23 = vpack.c.bf16 %v5894_v58, %v5876_v46  ;;  %v7932_v35 = vand.u32 4294901760, %v5859_v32 }
  0x8d   : > { %4777 = vmatpush3.bf16.msra.mxu0 %v4776_v1  ;;  %v4770_v59 = vpack.c.bf16 %v645_v44, %v638_v9  ;;  %v526_v34 = vand.u32 4294901760, %v525_v36  ;;  %785 = vmatprep.mubr.f32.mxu0 %v6054_v57  ;;  %v4786_v47 = vpack.c.bf16 %v5910_v12, %v5898_v63  ;;  %v7931_v36 = vand.u32 4294901760, %v5857_v31 }
  0x8e   : > { %4779 = vmatprep.subr.bf16.mxu0 %v4778_v29  ;;  %v533_v18 = vand.u32 4294901760, %v532_v13  ;;  %v7933_v44 = vand.u32 4294901760, %v5839_v15  ;;  %v7934_v29 = vand.u32 4294901760, %v5843_v21  ;;  %v7935_v52 = vand.u32 4294901760, %v5848_v25 }
  0x8f   : > { %4771 = vmatprep.subr.bf16.mxu1 %v4770_v59  ;;  %v4838_v9 = vpack.c.bf16 %v7932_v35, %v7931_v36  ;;  %v7936_v59 = vand.u32 4294901760, %v5850_v26  ;;  %v7937_v24 = vand.u32 4294901760, %v5854_v28  ;;  %v7939_v31 = vand.u32 4294901760, %v5868_v40 }
  0x90   : > { %v4772_v1 = vpack.c.bf16 %v533_v18, %v526_v34  ;;  %v4840_v13 = vpack.c.bf16 %v7934_v29, %v7933_v44  ;;  %v7938_v34 = vand.u32 4294901760, %v5864_v38  ;;  %v7940_v32 = vand.u32 4294901760, %v5871_v43  ;;  %v7954_v29 = vld [vmem:[#allocation16_spill] sm:$0xff] }
  0x91   : > { %v4842_v7 = vpack.c.bf16 %v7936_v59, %v7935_v52  ;;  %4781 = vmatpush3.bf16.msra.mxu0 %v4780_v33  ;;  %v7941_v15 = vand.u32 4294901760, %v5876_v46  ;;  %v7942_v21 = vand.u32 4294901760, %v5894_v58  ;;  %v7943_v25 = vand.u32 4294901760, %v5898_v63  ;;  %v232_v59 = vld [vmem:[#allocation5 + $0x188] sm:$0xff] }
  0x92   : > { %v4844_v18 = vpack.c.bf16 %v7938_v34, %v7937_v24  ;;  %v4846_v36 = vpack.c.bf16 %v7940_v32, %v7939_v31  ;;  %v7944_v26 = vand.u32 4294901760, %v5910_v12  ;;  %4773 = vmatpush3.bf16.msra.mxu1 %v4772_v1  ;;  %4783 = vmatprep.subr.bf16.mxu0 %v4782_v41  ;;  %v7945_v28 = vand.u32 4294901760, %v5914_v17  ;;  %v215_v34 = vld [vmem:[#allocation5 + $0x100] sm:$0xff]  ;;  %v216_v31 = vld [vmem:[#allocation5 + $0x108] sm:$0xff] }
  0x93   : > { %v6137_v35 = vpack.c.bf16 %v7942_v21, %v7941_v15  ;;  %v7946_v38 = vand.u32 4294901760, %v5925_v42  ;;  %v7947_v43 = vand.u32 4294901760, %v5929_v50  ;;  %v7948_v46 = vand.u32 4294901760, %v5938_v60  ;;  %4807 = vmatprep.subr.bf16.mxu1 %v5837_v14  ;;  %v7955_v32 = vld [vmem:[#allocation13_spill] sm:$0xff]  ;;  %v7956_v15 = vld [vmem:[#allocation14_spill] sm:$0xff] }
  0x94   : > { %v6143_v52 = vpack.c.bf16 %v7944_v26, %v7943_v25  ;;  %v7949_v63 = vand.u32 4294901760, %v5944_v5  ;;  %v7950_v12 = vand.u32 4294901760, %v5955_v30  ;;  %v4788_v33 = vpack.c.bf16 %v5925_v42, %v5914_v17 }
  0x95   : > { %v6149_v40 = vpack.c.bf16 %v7946_v38, %v7945_v28  ;;  %v6155_v58 = vpack.c.bf16 %v7948_v46, %v7947_v43  ;;  %650 = vmatmul.mubr.f32.vlgmr.msra.gmra.mrb[0].mxu1 %v6051_v37  ;;  %4785 = vmatpush3.bf16.msra.mxu0 %v4784_v23  ;;  %v4790_v41 = vpack.c.bf16 %v5938_v60, %v5929_v50  ;;  %v7951_v1 = vand.u32 4294901760, %v6054_v57  ;;  %v7952_v57 = vld [vmem:[#allocation11_spill] sm:$0xff]  ;;  %v7953_v23 = vld [vmem:[#allocation12_spill] sm:$0xff] }
  0x96   : > { %v6161_v24 = vpack.c.bf16 %v7950_v12, %v7949_v63  ;;  %4809 = vmatpush3.bf16.msra.mxu1 %v5841_v20  ;;  %4787 = vmatprep.subr.bf16.mxu0 %v4786_v47  ;;  %v4792_v44 = vpack.c.bf16 %v5955_v30, %v5944_v5  ;;  %v4794_v17 = vpack.c.bf16 %v5968_v55, %v5959_v51  ;;  %v231_v47 = vld [vmem:[#allocation5 + $0x180] sm:$0xff]  ;;  %v1225_v25 = vand.u32 4294901760, %v232_v59  ;;  %v7957_v28 = vld [vmem:[#allocation15_spill] sm:$0xff]  ;;  %v218_v63 = vld [vmem:[#allocation5 + $0x118] sm:$0xff] }
  0x97   : > { %4811 = vmatprep.subr.bf16.mxu1 %v5845_v22  ;;  %892 = vmatprep.mubr.f32.mxu1 %v7951_v1  ;;  %v4796_v42 = vpack.c.bf16 %v5985_v56, %v5974_v61  ;;  %v4798_v50 = vpack.c.bf16 %v5998_v2, %v5989_v10  ;;  %v4800_v60 = vpack.c.bf16 %v6015_v19, %v6004_v53  ;;  %v1222_v21 = vand.u32 4294901760, %v231_v47  ;;  %v233_v38 = vld [vmem:[#allocation5 + $0x190] sm:$0xff] }
  0x98   : > { %v4802_v5 = vpack.c.bf16 %v6029_v11, %v6019_v3  ;;  %v4804_v30 = vpack.c.bf16 %v6068_v54, %v6036_v8  ;;  %v1174_v26 = vand.u32 4294901760, %v215_v34  ;;  %v217_v46 = vld [vmem:[#allocation5 + $0x110] sm:$0xff]  ;;  %v6205_v12 = vsub.f32 %v232_v59, %v1225_v25 }
  0x99   : > { %4789 = vmatpush3.bf16.msra.mxu0 %v4788_v33  ;;  %v6203_v43 = vsub.f32 %v231_v47, %v1222_v21 }
  0x9a   : > { %4813 = vmatpush3.bf16.msra.mxu1 %v5852_v27  ;;  %4791 = vmatprep.subr.bf16.mxu0 %v4790_v41  ;;  %v1228_v41 = vand.u32 4294901760, %v233_v38  ;;  %v7778_v59 = vand.u32 4294901760, %v6205_v12 }
  0x9b   : > { %4815 = vmatprep.subr.bf16.mxu1 %v5866_v39 }
  0x9d   : > { %4793 = vmatpush3.bf16.msra.mxu0 %v4792_v44  ;;  %v7960_v44 = vand.u32 4294901760, %v5974_v61 }
  0x9e   : > { %4817 = vmatpush3.bf16.msra.mxu1 %v5874_v45  ;;  %4795 = vmatprep.subr.bf16.mxu0 %v4794_v17  ;;  %v7961_v17 = vand.u32 4294901760, %v5985_v56  ;;  %v7966_v56 = vand.u32 4294901760, %v6019_v3  ;;  %v219_v3 = vld [vmem:[#allocation5 + $0x120] sm:$0xff] }
  0x9f   : > { %4819 = vmatprep.subr.bf16.mxu1 %v5896_v62 }
  0xa1   : > { %4797 = vmatpush3.bf16.msra.mxu0 %v4796_v42  ;;  %v1183_v42 = vand.u32 4294901760, %v218_v63 }
  0xa2   : > { %4821 = vmatpush3.bf16.msra.mxu1 %v5912_v16  ;;  %4799 = vmatprep.subr.bf16.mxu0 %v4798_v50  ;;  %v235_v50 = vld [vmem:[#allocation5 + $0x1a0] sm:$0xff] }
  0xa3   : > { %4823 = vmatprep.subr.bf16.mxu1 %v5927_v49 }
  0xa5   : > { %4801 = vmatpush3.bf16.msra.mxu0 %v4800_v60  ;;  %v236_v60 = vld [vmem:[#allocation5 + $0x1a8] sm:$0xff] }
  0xa6   : > { %4825 = vmatpush3.bf16.msra.mxu1 %v5942_v4  ;;  %4803 = vmatprep.subr.bf16.mxu0 %v4802_v5 }
  0xa7   : > { %4827 = vmatprep.subr.bf16.mxu1 %v5957_v48 }
  0xa9   : > { %4805 = vmatpush3.bf16.msra.mxu0 %v4804_v30  ;;  %v7969_v30 = vand.u32 4294901760, %v6068_v54 }
  0xaa   : > { %4829 = vmatpush3.bf16.msra.mxu1 %v7952_v57  ;;  %4839 = vmatprep.subr.bf16.mxu0 %v4838_v9  ;;  %v1177_v9 = vand.u32 4294901760, %v216_v31 }
  0xab   : > { %4831 = vmatprep.subr.bf16.mxu1 %v7953_v23 }
  0xac   : > { %788 = vmatmul.mubr.f32.vlgmr.msra.gmra.mrb[2].mxu0 %v6064_v0  ;;  %v6209_v33 = vsub.f32 %v216_v31, %v1177_v9  ;;  %v4860_v0 = vpack.c.bf16 %v7961_v17, %v7960_v44  ;;  %v237_v17 = vld [vmem:[#allocation5 + $0x1b0] sm:$0xff] }
  0xad   : > { %4841 = vmatpush3.bf16.msra.mxu0 %v4840_v13  ;;  %1062 = vmatprep.mubr.f32.mxu0 %v7954_v29  ;;  %v234_v13 = vld [vmem:[#allocation5 + $0x198] sm:$0xff] }
  0xae   : > { %4833 = vmatpush3.bf16.msra.mxu1 %v7955_v32  ;;  %4843 = vmatprep.subr.bf16.mxu0 %v4842_v7  ;;  %v6207_v7 = vsub.f32 %v215_v34, %v1174_v26  ;;  %v1231_v1 = vand.u32 4294901760, %v234_v13  ;;  %v220_v34 = vld [vmem:[#allocation5 + $0x128] sm:$0xff]  ;;  %v7769_v31 = vand.u32 4294901760, %v6209_v33 }
  0xaf   : > { %4835 = vmatprep.subr.bf16.mxu1 %v7956_v15 }
  0xb0   : > { %v6260_v54 = vpack.c.bf16 %v1231_v1, %v1228_v41 }
  0xb1   : > { %4845 = vmatpush3.bf16.msra.mxu0 %v4844_v18  ;;  %v7958_v18 = vand.u32 4294901760, %v5959_v51 }
  0xb2   : > { %4837 = vmatpush3.bf16.msra.mxu1 %v7957_v28  ;;  %4847 = vmatprep.subr.bf16.mxu0 %v4846_v36  ;;  %v7959_v36 = vand.u32 4294901760, %v5968_v55  ;;  %v1180_v55 = vand.u32 4294901760, %v217_v46  ;;  %7971 = vst [vmem:[#allocation12_spill] sm:$0xff] %v6260_v54 }
  0xb3   : > { %4871 = vmatprep.subr.bf16.mxu1 %v5837_v14 }
  0xb4   : > { %v4858_v14 = vpack.c.bf16 %v7959_v36, %v7958_v18  ;;  %v1237_v18 = vand.u32 4294901760, %v236_v60  ;;  %v6268_v36 = vpack.c.bf16 %v1183_v42, %v1180_v55 }
  0xb5   : > { %896 = vmatmul.mubr.f32.vlgmr.msra.gmra.mrb[2].mxu1 %v415_v6  ;;  %4849 = vmatpush3.bf16.msra.mxu0 %v6137_v35  ;;  %v7962_v6 = vand.u32 4294901760, %v5989_v10  ;;  %v7963_v35 = vand.u32 4294901760, %v5998_v2  ;;  %v7967_v10 = vand.u32 4294901760, %v6029_v11  ;;  %v7968_v2 = vand.u32 4294901760, %v6036_v8 }
  0xb6   : > { %4873 = vmatpush3.bf16.msra.mxu1 %v5841_v20  ;;  %4851 = vmatprep.subr.bf16.mxu0 %v6143_v52  ;;  %v7964_v20 = vand.u32 4294901760, %v6004_v53  ;;  %v7965_v52 = vand.u32 4294901760, %v6015_v19  ;;  %v178_v53 = vld [vmem:[%s5827_s29 + $0x18] sm:$0xff]  ;;  %v6252_v19 = vpack.c.bf16 %v1225_v25, %v1222_v21  ;;  %v7775_v11 = vand.u32 4294901760, %v6207_v7  ;;  %7972 = vst [vmem:[#allocation16_spill] sm:$0xff] %v6268_v36 }
  0xb7   : > { %v6228_v51 = vpack.c.bf16 %v7963_v35, %v7962_v6  ;;  %4875 = vmatprep.subr.bf16.mxu1 %v5845_v22  ;;  %v6241_v5 = vpack.c.bf16 %v7967_v10, %v7966_v56  ;;  %v6247_v47 = vpack.c.bf16 %v7969_v30, %v7968_v2  ;;  %1166 = vmatprep.mubr.f32.mxu1 %v7954_v29  ;;  %v7779_v22 = vand.u32 4294901760, %v6203_v43 }
  0xb8   : > { %v6235_v61 = vpack.c.bf16 %v7965_v52, %v7964_v20  ;;  %v6258_v8 = vpack.c.bf16 %v1177_v9, %v1174_v26  ;;  %v1234_v29 = vand.u32 4294901760, %v235_v50  ;;  %v6264_v21 = vsub.f32 %v233_v38, %v1228_v41  ;;  %v221_v52 = vld [vmem:[#allocation5 + $0x130] sm:$0xff] }
  0xb9   : > { %4853 = vmatpush3.bf16.msra.mxu0 %v6149_v40  ;;  %v6266_v25 = vsub.f32 %v234_v13, %v1231_v1  ;;  %v6270_v44 = vand.u32 4294901760, %v178_v53  ;;  %v6273_v40 = vsub.f32 %v217_v46, %v1180_v55  ;;  %v1401_v26 = vsub.f32 %v6203_v43, %v7779_v22  ;;  %v226_v22 = vld [vmem:[#allocation5 + $0x158] sm:$0xff] }
  0xba   : > { %7970 = vst [vmem:[#allocation11_spill] sm:$0xff] %v6258_v8  ;;  %4877 = vmatpush3.bf16.msra.mxu1 %v5852_v27  ;;  %4855 = vmatprep.subr.bf16.mxu0 %v6155_v58  ;;  %v1186_v9 = vand.u32 4294901760, %v219_v3  ;;  %v1189_v27 = vand.u32 4294901760, %v220_v34  ;;  %v238_v58 = vld [vmem:[#allocation5 + $0x1b8] sm:$0xff]  ;;  %v6278_v38 = vsub.f32 %v218_v63, %v1183_v42  ;;  %v1408_v13 = vsub.f32 %v6205_v12, %v7778_v59 }
  0xbb   : > { %7973 = vst [vmem:[#allocation13_spill] sm:$0xff] %v6270_v44  ;;  %4879 = vmatprep.subr.bf16.mxu1 %v5866_v39  ;;  %v1289_v39 = vsub.f32 %v6207_v7, %v7775_v11  ;;  %v1296_v46 = vsub.f32 %v6209_v33, %v7769_v31  ;;  %v6290_v41 = vpack.c.bf16 %v1237_v18, %v1234_v29  ;;  %v1240_v35 = vand.u32 4294901760, %v237_v17  ;;  %v239_v31 = vld [vmem:[#allocation5 + $0x1c0] sm:$0xff] }
  0xbc   : > { %v6292_v1 = vsub.f32 %v235_v50, %v1234_v29  ;;  %v6294_v63 = vsub.f32 %v236_v60, %v1237_v18  ;;  %v6297_v6 = vsub.f32 %v178_v53, %v6270_v44  ;;  %v1243_v55 = vand.u32 4294901760, %v238_v58 }
  0xbd   : > { %4857 = vmatpush3.bf16.msra.mxu0 %v6161_v24  ;;  %7974 = vst [vmem:[#allocation14_spill] sm:$0xff] %v6290_v41  ;;  %v7773_v42 = vand.u32 4294901760, %v6264_v21  ;;  %v7770_v20 = vand.u32 4294901760, %v6266_v25  ;;  %v222_v24 = vld [vmem:[#allocation5 + $0x138] sm:$0xff]  ;;  %v1402_v50 = vand.u32 4294901760, %v1401_v26  ;;  %v6303_v56 = vpack.c.bf16 %v1189_v27, %v1186_v9 }
  0xbe   : > { %4881 = vmatpush3.bf16.msra.mxu1 %v5874_v45  ;;  %4859 = vmatprep.subr.bf16.mxu0 %v4858_v14  ;;  %v6305_v60 = vsub.f32 %v219_v3, %v1186_v9  ;;  %v6307_v10 = vsub.f32 %v220_v34, %v1189_v27  ;;  %v1409_v2 = vand.u32 4294901760, %v1408_v13  ;;  %v1290_v45 = vand.u32 4294901760, %v1289_v39  ;;  %v240_v27 = vld [vmem:[#allocation5 + $0x1c8] sm:$0xff] }
  0xbf   : > { %4883 = vmatprep.subr.bf16.mxu1 %v5896_v62  ;;  %7975 = vst [vmem:[#allocation15_spill] sm:$0xff] %v6303_v56  ;;  %v1297_v14 = vand.u32 4294901760, %v1296_v46  ;;  %v7772_v30 = vand.u32 4294901760, %v6273_v40  ;;  %v1192_v53 = vand.u32 4294901760, %v221_v52  ;;  %v1195_v29 = vand.u32 4294901760, %v222_v24 }
  0xc0   : > { %v7771_v18 = vand.u32 4294901760, %v6278_v38  ;;  %v7782_v62 = vand.u32 4294901760, %v6297_v6  ;;  %v6314_v3 = vpack.c.bf16 %v1243_v55, %v1240_v35  ;;  %v1415_v34 = vsub.f32 %v6264_v21, %v7773_v42 }
  0xc1   : > { %4861 = vmatpush3.bf16.msra.mxu0 %v4860_v0  ;;  %v1422_v0 = vsub.f32 %v6266_v25, %v7770_v20  ;;  %v6323_v26 = vsub.f32 %v237_v17, %v1240_v35  ;;  %v6325_v9 = vsub.f32 %v238_v58, %v1243_v55  ;;  %v6329_v13 = vpack.c.bf16 %v1409_v2, %v1402_v50 }
  0xc2   : > { %4885 = vmatpush3.bf16.msra.mxu1 %v5912_v16  ;;  %4863 = vmatprep.subr.bf16.mxu0 %v6228_v51  ;;  %7976 = vst [vmem:[#allocation17_spill] sm:$0xff] %v6314_v3  ;;  %v7774_v16 = vand.u32 4294901760, %v6292_v1  ;;  %v7777_v51 = vand.u32 4294901760, %v6294_v63  ;;  %v6331_v39 = vpack.c.bf16 %v1297_v14, %v1290_v45  ;;  %v1303_v46 = vsub.f32 %v6273_v40, %v7772_v30 }
  0xc3   : > { %4887 = vmatprep.subr.bf16.mxu1 %v5927_v49  ;;  %v1246_v20 = vand.u32 4294901760, %v239_v31  ;;  %v6337_v49 = vpack.c.bf16 %v1195_v29, %v1192_v53  ;;  %v1310_v17 = vsub.f32 %v6278_v38, %v7771_v18  ;;  %v7776_v58 = vand.u32 4294901760, %v6305_v60 }
  0xc4   : > { %v1272_v35 = vsub.f32 %v6297_v6, %v7782_v62  ;;  %v1416_v55 = vand.u32 4294901760, %v1415_v34  ;;  %v1423_v50 = vand.u32 4294901760, %v1422_v0  ;;  %v1249_v2 = vand.u32 4294901760, %v240_v27  ;;  %v224_v0 = vld [vmem:[#allocation5 + $0x148] sm:$0xff] }
  0xc5   : > { %4865 = vmatpush3.bf16.msra.mxu0 %v6235_v61  ;;  %7977 = vst [vmem:[#allocation18_spill] sm:$0xff] %v6337_v49  ;;  %v223_v61 = vld [vmem:[#allocation5 + $0x140] sm:$0xff]  ;;  %v7781_v45 = vand.u32 4294901760, %v6307_v10  ;;  %v6350_v14 = vsub.f32 %v221_v52, %v1192_v53  ;;  %v6352_v18 = vsub.f32 %v222_v24, %v1195_v29  ;;  %v1429_v30 = vsub.f32 %v6292_v1, %v7774_v16  ;;  %v241_v29 = vld [vmem:[#allocation5 + $0x1d0] sm:$0xff]  ;;  %v242_v16 = vld [vmem:[#allocation5 + $0x1d8] sm:$0xff] }
  0xc6   : > { %4889 = vmatpush3.bf16.msra.mxu1 %v5942_v4  ;;  %4867 = vmatprep.subr.bf16.mxu0 %v6241_v5  ;;  %v1436_v4 = vsub.f32 %v6294_v63, %v7777_v51  ;;  %v1304_v5 = vand.u32 4294901760, %v1303_v46  ;;  %v6360_v34 = vsub.f32 %v239_v31, %v1246_v20  ;;  %v7780_v42 = vand.u32 4294901760, %v6323_v26 }
  0xc7   : > { %4891 = vmatprep.subr.bf16.mxu1 %v5957_v48  ;;  %v7783_v48 = vand.u32 4294901760, %v6325_v9  ;;  %v1311_v52 = vand.u32 4294901760, %v1310_v17  ;;  %v1198_v24 = vand.u32 4294901760, %v223_v61  ;;  %v1317_v53 = vsub.f32 %v6305_v60, %v7776_v58 }
  0xc8   : > { %v1273_v11 = vand.u32 4294901760, %v1272_v35  ;;  %v6370_v31 = vpack.c.bf16 %v1423_v50, %v1416_v55  ;;  %v6372_v46 = vpack.c.bf16 %v1249_v2, %v1246_v20  ;;  %v6378_v17 = vsub.f32 %v240_v27, %v1249_v2  ;;  %v225_v35 = vld [vmem:[#allocation5 + $0x150] sm:$0xff] }
  0xc9   : > { %4869 = vmatpush3.bf16.msra.mxu0 %v6247_v47  ;;  %v1324_v47 = vsub.f32 %v6307_v10, %v7781_v45  ;;  %v1430_v58 = vand.u32 4294901760, %v1429_v30  ;;  %v1437_v51 = vand.u32 4294901760, %v1436_v4  ;;  %v1201_v59 = vand.u32 4294901760, %v224_v0 }
  0xca   : > { %4893 = vmatpush3.bf16.msra.mxu1 %v7952_v57  ;;  %4903 = vmatprep.subr.bf16.mxu0 %v6252_v19  ;;  %7978 = vst [vmem:[#allocation19_spill] sm:$0xff] %v6372_v46  ;;  %v1252_v57 = vand.u32 4294901760, %v241_v29  ;;  %v1255_v55 = vand.u32 4294901760, %v242_v16  ;;  %v1443_v20 = vsub.f32 %v6323_v26, %v7780_v42  ;;  %v1450_v50 = vsub.f32 %v6325_v9, %v7783_v48  ;;  %v243_v48 = vld [vmem:[#allocation5 + $0x1e0] sm:$0xff] }
  0xcb   : > { %4895 = vmatprep.subr.bf16.mxu1 %v7953_v23  ;;  %v6388_v23 = vpack.c.bf16 %v1311_v52, %v1304_v5  ;;  %v6390_v30 = vsub.f32 %v223_v61, %v1198_v24  ;;  %v1318_v27 = vand.u32 4294901760, %v1317_v53  ;;  %v1325_v4 = vand.u32 4294901760, %v1324_v47  ;;  %v244_v53 = vld [vmem:[#allocation5 + $0x1e8] sm:$0xff] }
  0xcc   : > { %1064 = vmatmul.mubr.f32.vlgmr.msra.gmra.mrb[4].mxu0 %v6051_v37  ;;  %v1204_v42 = vand.u32 4294901760, %v225_v35  ;;  %v1207_v45 = vand.u32 4294901760, %v226_v22  ;;  %v7790_v62 = vand.u32 4294901760, %v6352_v18  ;;  %v6397_v5 = vpack.c.bf16 %v1437_v51, %v1430_v58 }
  0xcd   : > { %4905 = vmatpush3.bf16.msra.mxu0 %v6258_v8  ;;  %1274 = vmatprep.mubr.f32.mxu0 %v1273_v11  ;;  %v6399_v61 = vpack.c.bf16 %v1201_v59, %v1198_v24  ;;  %v6401_v52 = vsub.f32 %v224_v0, %v1201_v59  ;;  %v7788_v11 = vand.u32 4294901760, %v6360_v34  ;;  %v1444_v2 = vand.u32 4294901760, %v1443_v20  ;;  %v6407_v8 = vld [vmem:[#allocation5 + $0x160] sm:$0xff] }
  0xce   : > { %4897 = vmatpush3.bf16.msra.mxu1 %v7955_v32  ;;  %4907 = vmatprep.subr.bf16.mxu0 %v6260_v54  ;;  %v6404_v32 = vpack.c.bf16 %v1255_v55, %v1252_v57  ;;  %v1451_v47 = vand.u32 4294901760, %v1450_v50  ;;  %v7789_v54 = vand.u32 4294901760, %v6378_v17  ;;  %v6412_v51 = vsub.f32 %v242_v16, %v1255_v55  ;;  %v6434_v50 = vld [vmem:[#allocation5 + $0x168] sm:$0xff] }
  0xcf   : > { %4899 = vmatprep.subr.bf16.mxu1 %v7956_v15  ;;  %v6410_v15 = vsub.f32 %v241_v29, %v1252_v57  ;;  %v7982_v59 = vand.u32 4294901760, %v6350_v14  ;;  %v1258_v0 = vand.u32 4294901760, %v243_v48  ;;  %v6419_v24 = vpack.c.bf16 %v1325_v4, %v1318_v27 }
  0xd0   : > { %7979 = vst [vmem:[#allocation20_spill] sm:$0xff] %v6404_v32  ;;  %7981 = vst [vmem:[#allocation22_spill] sm:$0xff] %v6412_v51  ;;  %v6421_v20 = vpack.c.bf16 %v1207_v45, %v1204_v42  ;;  %v1338_v29 = vsub.f32 %v6352_v18, %v7790_v62  ;;  %v1261_v57 = vand.u32 4294901760, %v244_v53  ;;  %v6427_v16 = vsub.f32 %v225_v35, %v1204_v42 }
  0xd1   : > { %4909 = vmatpush3.bf16.msra.mxu0 %v6268_v36  ;;  %7980 = vst [vmem:[#allocation21_spill] sm:$0xff] %v6410_v15  ;;  %v1331_v58 = vsub.f32 %v6350_v14, %v7982_v59  ;;  %v6429_v55 = vsub.f32 %v226_v22, %v1207_v45  ;;  %v7791_v27 = vand.u32 4294901760, %v6407_v8  ;;  %v4946_v4 = vpack.c.bf16 %v1451_v47, %v1444_v2  ;;  %v6442_v22 = vld [vmem:[#allocation5 + $0x1f0] sm:$0xff]  ;;  %v6444_v45 = vld [vmem:[#allocation5 + $0x1f8] sm:$0xff] }
  0xd2   : > { %4901 = vmatpush3.bf16.msra.mxu1 %v7957_v28  ;;  %4911 = vmatprep.subr.bf16.mxu0 %v6290_v41  ;;  %v1457_v28 = vsub.f32 %v6360_v34, %v7788_v11  ;;  %v1464_v59 = vsub.f32 %v6378_v17, %v7789_v54  ;;  %v6448_v11 = vsub.f32 %v243_v48, %v1258_v0  ;;  %v177_v54 = vld [vmem:[%s5827_s29 + $0x10] sm:$0xff]  ;;  %v1339_v62 = vand.u32 4294901760, %v1338_v29 }
  0xd3   : > { %4935 = vmatprep.subr.bf16.mxu1 %v6329_v13  ;;  %v1332_v35 = vand.u32 4294901760, %v1331_v58  ;;  %v6455_v42 = vpack.c.bf16 %v1261_v57, %v1258_v0  ;;  %v6457_v13 = vsub.f32 %v244_v53, %v1261_v57  ;;  %v6464_v58 = vsub.f32 %v6407_v8, %v7791_v27  ;;  %v6468_v2 = vld [vmem:[#allocation5 + $0x170] sm:$0xff]  ;;  %v6470_v0 = vld [vmem:[#allocation5 + $0x178] sm:$0xff] }
  0xd4   : > { %v1458_v48 = vand.u32 4294901760, %v1457_v28  ;;  %v1264_v47 = vand.u32 4294901760, %v6442_v22  ;;  %v1465_v53 = vand.u32 4294901760, %v1464_v59  ;;  %v7983_v29 = vand.u32 4294901760, %v6390_v30 }
  0xd5   : > { %1168 = vmatmul.mubr.f32.vlgmr.msra.gmra.mrb[4].mxu1 %v6051_v37  ;;  %4913 = vmatpush3.bf16.msra.mxu0 %v6303_v56  ;;  %v1213_v37 = vand.u32 4294901760, %v6434_v50  ;;  %v7984_v57 = vand.u32 4294901760, %v6401_v52  ;;  %v6479_v27 = vand.u32 4294901760, %v177_v54  ;;  %v7986_v41 = vand.u32 4294901760, %v6412_v51 }
  0xd6   : > { %4937 = vmatpush3.bf16.msra.mxu1 %v6331_v39  ;;  %4915 = vmatprep.subr.bf16.mxu0 %v6314_v3  ;;  %v1267_v39 = vand.u32 4294901760, %v6444_v45  ;;  %v7985_v3 = vand.u32 4294901760, %v6410_v15 }
  0xd7   : > { %4939 = vmatprep.subr.bf16.mxu1 %v6370_v31  ;;  %1510 = vmatprep.mubr.f32.mxu1 %v6270_v44  ;;  %v1345_v31 = vsub.f32 %v6390_v30, %v7983_v29  ;;  %v1352_v28 = vsub.f32 %v6401_v52, %v7984_v57  ;;  %v1478_v59 = vsub.f32 %v6412_v51, %v7986_v41  ;;  %v7812_v29 = vand.u32 4294901760, %v6457_v13 }
  0xd8   : > { %v1471_v56 = vsub.f32 %v6410_v15, %v7985_v3  ;;  %v4948_v57 = vpack.c.bf16 %v1339_v62, %v1332_v35  ;;  %v6493_v36 = vsub.f32 %v6434_v50, %v1213_v37  ;;  %v1219_v3 = vand.u32 4294901760, %v6470_v0 }
  0xd9   : > { %4917 = vmatpush3.bf16.msra.mxu0 %v6337_v49  ;;  %v1216_v49 = vand.u32 4294901760, %v6468_v2  ;;  %v6499_v41 = vsub.f32 %v6442_v22, %v1264_v47  ;;  %v6502_v44 = vsub.f32 %v6444_v45, %v1267_v39  ;;  %v4950_v62 = vpack.c.bf16 %v1465_v53, %v1458_v48 }
  0xda   : > { %4941 = vmatpush3.bf16.msra.mxu1 %v6388_v23  ;;  %4919 = vmatprep.subr.bf16.mxu0 %v6372_v46  ;;  %v1346_v35 = vand.u32 4294901760, %v1345_v31  ;;  %v1353_v50 = vand.u32 4294901760, %v1352_v28  ;;  %v6507_v46 = vsub.f32 %v177_v54, %v6479_v27  ;;  %v1472_v51 = vand.u32 4294901760, %v1471_v56 }
  0xdb   : > { %4943 = vmatprep.subr.bf16.mxu1 %v6397_v5  ;;  %v1479_v5 = vand.u32 4294901760, %v1478_v59  ;;  %v7987_v22 = vand.u32 4294901760, %v6427_v16  ;;  %v7988_v45 = vand.u32 4294901760, %v6429_v55  ;;  %v6519_v48 = vsub.f32 %v6468_v2, %v1216_v49 }
  0xdc   : > { %v6522_v54 = vsub.f32 %v6470_v0, %v1219_v3  ;;  %v7989_v31 = vand.u32 4294901760, %v6448_v11  ;;  %v1498_v59 = vand.u32 4294901760, %v6499_v41  ;;  %v7990_v0 = vand.u32 4294901760, %v6407_v8 }
  0xdd   : > { %4921 = vmatpush3.bf16.msra.mxu0 %v6399_v61  ;;  %v1359_v15 = vsub.f32 %v6427_v16, %v7987_v22  ;;  %v1366_v23 = vsub.f32 %v6429_v55, %v7988_v45  ;;  %v6538_v45 = vpack.c.bf16 %v1267_v39, %v1264_v47  ;;  %v4952_v53 = vpack.c.bf16 %v1353_v50, %v1346_v35 }
  0xde   : > { %4945 = vmatpush3.bf16.msra.mxu1 %v6419_v24  ;;  %4923 = vmatprep.subr.bf16.mxu0 %v6404_v32  ;;  %v1485_v28 = vsub.f32 %v6448_v11, %v7989_v31  ;;  %v1492_v24 = vsub.f32 %v6457_v13, %v7812_v29  ;;  %v6536_v22 = vpack.c.bf16 %v1213_v37, %v7990_v0  ;;  %v7991_v29 = vand.u32 4294901760, %v6464_v58 }
  0xdf   : > { %4947 = vmatprep.subr.bf16.mxu1 %v4946_v4  ;;  %v1277_v4 = vand.u32 4294901760, %v6507_v46  ;;  %v4954_v31 = vpack.c.bf16 %v1479_v5, %v1472_v51  ;;  %v1360_v56 = vand.u32 4294901760, %v1359_v15  ;;  %v1367_v32 = vand.u32 4294901760, %v1366_v23 }
  0xe0   : > { %v1373_v2 = vsub.f32 %v6464_v58, %v7991_v29  ;;  %v7992_v8 = vand.u32 4294901760, %v6493_v36  ;;  %v7813_v37 = vand.u32 4294901760, %v6519_v48  ;;  %v7814_v39 = vand.u32 4294901760, %v6522_v54 }
  0xe1   : > { %4925 = vmatpush3.bf16.msra.mxu0 %v6421_v20  ;;  %v1486_v35 = vand.u32 4294901760, %v1485_v28  ;;  %v1493_v51 = vand.u32 4294901760, %v1492_v24  ;;  %v1499_v15 = vsub.f32 %v6499_v41, %v1498_v59  ;;  %v1278_v29 = vsub.f32 %v6507_v46, %v1277_v4 }
  0xe2   : > { %4949 = vmatpush3.bf16.msra.mxu1 %v4948_v57  ;;  %4927 = vmatprep.subr.bf16.mxu0 %v6455_v42  ;;  %v1380_v47 = vsub.f32 %v6493_v36, %v7992_v8  ;;  %v7993_v57 = vand.u32 4294901760, %v6502_v44  ;;  %v6561_v50 = vpack.c.bf16 %v1219_v3, %v1216_v49  ;;  %v4956_v5 = vpack.c.bf16 %v1367_v32, %v1360_v56 }
  0xe3   : > { %4951 = vmatprep.subr.bf16.mxu1 %v4950_v62  ;;  %v4966_v62 = vpack.c.bf16 %v6205_v12, %v6203_v43  ;;  %v1374_v28 = vand.u32 4294901760, %v1373_v2  ;;  %v1387_v0 = vsub.f32 %v6519_v48, %v7813_v37  ;;  %v1394_v8 = vsub.f32 %v6522_v54, %v7814_v39 }
  0xe4   : > { %v1506_v23 = vsub.f32 %v6502_v44, %v7993_v57  ;;  %v1381_v24 = vand.u32 4294901760, %v1380_v47  ;;  %v4958_v49 = vpack.c.bf16 %v1493_v51, %v1486_v35  ;;  %v1500_v3 = vand.u32 4294901760, %v1499_v15 }
  0xe5   : > { %4929 = vmatpush3.bf16.msra.mxu0 %v6536_v22  ;;  %v1279_v56 = vand.u32 4294901760, %v1278_v29  ;;  %v4970_v47 = vpack.c.bf16 %v6266_v25, %v6264_v21  ;;  %v1388_v57 = vand.u32 4294901760, %v1387_v0  ;;  %v1395_v37 = vand.u32 4294901760, %v1394_v8  ;;  %v7994_v29 = vld [vmem:[#allocation11_spill] sm:$0xff]  ;;  %v7998_v0 = vld [vmem:[#allocation21_spill] sm:$0xff]  ;;  %v7999_v8 = vld [vmem:[#allocation22_spill] sm:$0xff] }
  0xe6   : > { %4953 = vmatpush3.bf16.msra.mxu1 %v4952_v53  ;;  %4931 = vmatprep.subr.bf16.mxu0 %v6538_v45  ;;  %v1507_v32 = vand.u32 4294901760, %v1506_v23  ;;  %v4968_v53 = vpack.c.bf16 %v6209_v33, %v6207_v7  ;;  %v4960_v2 = vpack.c.bf16 %v1381_v24, %v1374_v28  ;;  %v4974_v51 = vpack.c.bf16 %v6294_v63, %v6292_v1  ;;  %v7997_v24 = vld [vmem:[#allocation16_spill] sm:$0xff] }
  0xe7   : > { %4955 = vmatprep.subr.bf16.mxu1 %v4954_v31  ;;  %v4972_v31 = vpack.c.bf16 %v6278_v38, %v6273_v40  ;;  %v4964_v35 = vpack.c.bf16 %v1395_v37, %v1388_v57  ;;  %v4976_v15 = vpack.c.bf16 %v6307_v10, %v6305_v60  ;;  %v4978_v23 = vpack.c.bf16 %v6325_v9, %v6323_v26 }
  0xe8   : > { %v4962_v39 = vpack.c.bf16 %v1507_v32, %v1500_v3  ;;  %v4980_v37 = vpack.c.bf16 %v6352_v18, %v6350_v14  ;;  %v4984_v28 = vpack.c.bf16 %v6401_v52, %v6390_v30  ;;  %v8000_v3 = vld [vmem:[#allocation14_spill] sm:$0xff]  ;;  %v4988_v32 = vpack.c.bf16 %v6429_v55, %v6427_v16 }
  0xe9   : > { %4933 = vmatpush3.bf16.msra.mxu0 %v6561_v50  ;;  %v4994_v57 = vpack.c.bf16 %v6502_v44, %v6499_v41 }
  0xea   : > { %4957 = vmatpush3.bf16.msra.mxu1 %v4956_v5  ;;  %4967 = vmatprep.subr.bf16.mxu0 %v4966_v62  ;;  %v7995_v5 = vld [vmem:[#allocation12_spill] sm:$0xff]  ;;  %v7996_v62 = vand.u32 4294901760, %v6297_v6 }
  0xeb   : > { %4959 = vmatprep.subr.bf16.mxu1 %v4958_v49  ;;  %v4986_v49 = vpack.c.bf16 %v7999_v8, %v7998_v0 }
  0xec   : > { %1280 = vmatmul.mubr.f32.vlgmr.msra.gmra.mrb[6].mxu0 %v1279_v56  ;;  %v8001_v56 = vld [vmem:[#allocation15_spill] sm:$0xff] }
  0xed   : > { %4969 = vmatpush3.bf16.msra.mxu0 %v4968_v53  ;;  %1647 = vmatprep.mubr.f32.mxu0 %v6297_v6  ;;  %v4990_v6 = vpack.c.bf16 %v6457_v13, %v6448_v11  ;;  %v8002_v53 = vld [vmem:[#allocation17_spill] sm:$0xff] }
  0xee   : > { %4961 = vmatpush3.bf16.msra.mxu1 %v4960_v2  ;;  %4971 = vmatprep.subr.bf16.mxu0 %v4970_v47  ;;  %v4992_v2 = vpack.c.bf16 %v6493_v36, %v6464_v58  ;;  %v8003_v47 = vld [vmem:[#allocation18_spill] sm:$0xff] }
  0xef   : > { %4963 = vmatprep.subr.bf16.mxu1 %v4962_v39  ;;  %v4982_v39 = vpack.c.bf16 %v6378_v17, %v6360_v34 }
  0xf1   : > { %4973 = vmatpush3.bf16.msra.mxu0 %v4972_v31  ;;  %v8004_v31 = vld [vmem:[#allocation19_spill] sm:$0xff] }
  0xf2   : > { %4965 = vmatpush3.bf16.msra.mxu1 %v4964_v35  ;;  %4975 = vmatprep.subr.bf16.mxu0 %v4974_v51  ;;  %v4996_v35 = vpack.c.bf16 %v6522_v54, %v6519_v48  ;;  %v8005_v51 = vand.u32 4294901760, %v6203_v43  ;;  %v263_v43 = vld [vmem:[#allocation5 + $0x280] sm:$0xff] }
  0xf3   : > { %4999 = vmatprep.subr.bf16.mxu1 %v6252_v19 }
  0xf5   : > { %1512 = vmatmul.mubr.f32.vlgmr.msra.gmra.mrb[6].mxu1 %v6479_v27  ;;  %4977 = vmatpush3.bf16.msra.mxu0 %v4976_v15  ;;  %v8006_v15 = vand.u32 4294901760, %v6205_v12  ;;  %v8012_v12 = vand.u32 4294901760, %v6273_v40  ;;  %v8017_v40 = vand.u32 4294901760, %v6305_v60  ;;  %v8021_v60 = vand.u32 4294901760, %v6350_v14 }
  0xf6   : > { %5001 = vmatpush3.bf16.msra.mxu1 %v7994_v29  ;;  %4979 = vmatprep.subr.bf16.mxu0 %v4978_v23  ;;  %v8028_v14 = vand.u32 4294901760, %v7999_v8  ;;  %v8032_v8 = vand.u32 4294901760, %v6457_v13  ;;  %v8034_v13 = vand.u32 4294901760, %v6493_v36 }
  0xf7   : > { %5003 = vmatprep.subr.bf16.mxu1 %v7995_v5  ;;  %1754 = vmatprep.mubr.f32.mxu1 %v7996_v62  ;;  %v5030_v23 = vpack.c.bf16 %v8006_v15, %v8005_v51  ;;  %v8009_v62 = vand.u32 4294901760, %v6209_v33  ;;  %v2084_v51 = vand.u32 4294901760, %v263_v43  ;;  %v247_v15 = vld [vmem:[#allocation5 + $0x200] sm:$0xff] }
  0xf9   : > { %4981 = vmatpush3.bf16.msra.mxu0 %v4980_v37  ;;  %v8007_v37 = vld [vmem:[#allocation20_spill] sm:$0xff] }
  0xfa   : > { %5005 = vmatpush3.bf16.msra.mxu1 %v7997_v24  ;;  %4983 = vmatprep.subr.bf16.mxu0 %v4982_v39  ;;  %v8008_v39 = vand.u32 4294901760, %v6207_v7  ;;  %v8013_v7 = vand.u32 4294901760, %v6278_v38  ;;  %v8018_v38 = vand.u32 4294901760, %v6307_v10  ;;  %v8022_v10 = vand.u32 4294901760, %v6352_v18 }
  0xfb   : > { %5007 = vmatprep.subr.bf16.mxu1 %v8000_v3 }
  0xfc   : > { %v5036_v33 = vpack.c.bf16 %v8013_v7, %v8012_v12  ;;  %v5044_v7 = vpack.c.bf16 %v8022_v10, %v8021_v60  ;;  %v267_v60 = vld [vmem:[#allocation5 + $0x2a0] sm:$0xff] }
  0xfd   : > { %4985 = vmatpush3.bf16.msra.mxu0 %v4984_v28  ;;  %v5032_v28 = vpack.c.bf16 %v8009_v62, %v8008_v39  ;;  %v5040_v39 = vpack.c.bf16 %v8018_v38, %v8017_v40  ;;  %v250_v40 = vld [vmem:[#allocation5 + $0x218] sm:$0xff]  ;;  %v8026_v38 = vand.u32 4294901760, %v6401_v52 }
  0xfe   : > { %5009 = vmatpush3.bf16.msra.mxu1 %v8001_v56  ;;  %4987 = vmatprep.subr.bf16.mxu0 %v4986_v49  ;;  %v8010_v49 = vand.u32 4294901760, %v6264_v21  ;;  %v8015_v21 = vand.u32 4294901760, %v6292_v1  ;;  %v8019_v1 = vand.u32 4294901760, %v6323_v26  ;;  %v249_v26 = vld [vmem:[#allocation5 + $0x210] sm:$0xff] }
  0xff   : > { %5011 = vmatprep.subr.bf16.mxu1 %v8002_v53 }
 0x101   : > { %4989 = vmatpush3.bf16.msra.mxu0 %v4988_v32  ;;  %v8011_v32 = vand.u32 4294901760, %v6266_v25  ;;  %v8016_v25 = vand.u32 4294901760, %v6294_v63  ;;  %v8020_v63 = vand.u32 4294901760, %v6325_v9  ;;  %v8025_v9 = vand.u32 4294901760, %v6390_v30 }
 0x102   : > { %5013 = vmatpush3.bf16.msra.mxu1 %v8003_v47  ;;  %4991 = vmatprep.subr.bf16.mxu0 %v4990_v6  ;;  %v8030_v30 = vand.u32 4294901760, %v6429_v55  ;;  %v180_v55 = vld [vmem:[%s5827_s29 + $0x28] sm:$0xff] }
 0x103   : > { %5015 = vmatprep.subr.bf16.mxu1 %v8004_v31  ;;  %v5034_v6 = vpack.c.bf16 %v8011_v32, %v8010_v49  ;;  %v266_v49 = vld [vmem:[#allocation5 + $0x298] sm:$0xff]  ;;  %v5042_v32 = vpack.c.bf16 %v8020_v63, %v8019_v1  ;;  %v5048_v1 = vpack.c.bf16 %v8026_v38, %v8025_v9 }
 0x105   : > { %4993 = vmatpush3.bf16.msra.mxu0 %v4992_v2  ;;  %v8014_v2 = vld [vmem:[#allocation13_spill] sm:$0xff] }
 0x106   : > { %5017 = vmatpush3.bf16.msra.mxu1 %v6399_v61  ;;  %4995 = vmatprep.subr.bf16.mxu0 %v4994_v57  ;;  %v5038_v57 = vpack.c.bf16 %v8016_v25, %v8015_v21  ;;  %v8024_v21 = vand.u32 4294901760, %v6378_v17  ;;  %v268_v17 = vld [vmem:[#allocation5 + $0x2a8] sm:$0xff] }
 0x107   : > { %5019 = vmatprep.subr.bf16.mxu1 %v8007_v37 }
 0x109   : > { %4997 = vmatpush3.bf16.msra.mxu0 %v4996_v35  ;;  %v264_v35 = vld [vmem:[#allocation5 + $0x288] sm:$0xff] }
 0x10a   : > { %5021 = vmatpush3.bf16.msra.mxu1 %v6421_v20  ;;  %5031 = vmatprep.subr.bf16.mxu0 %v5030_v23  ;;  %v248_v23 = vld [vmem:[#allocation5 + $0x208] sm:$0xff]  ;;  %v2087_v62 = vand.u32 4294901760, %v264_v35 }
 0x10b   : > { %5023 = vmatprep.subr.bf16.mxu1 %v6455_v42  ;;  %v2039_v12 = vand.u32 4294901760, %v248_v23 }
 0x10c   : > { %1650 = vmatmul.mubr.f32.vlgmr.msra.gmra.mrb[8].mxu0 %v6507_v46 }
 0x10d   : > { %5033 = vmatpush3.bf16.msra.mxu0 %v5032_v28  ;;  %1924 = vmatprep.mubr.f32.mxu0 %v8014_v2  ;;  %v265_v28 = vld [vmem:[#allocation5 + $0x290] sm:$0xff] }
 0x10e   : > { %5025 = vmatpush3.bf16.msra.mxu1 %v6536_v22  ;;  %5035 = vmatprep.subr.bf16.mxu0 %v5034_v6  ;;  %v2036_v6 = vand.u32 4294901760, %v247_v15  ;;  %v2090_v63 = vand.u32 4294901760, %v265_v28 }
 0x10f   : > { %5027 = vmatprep.subr.bf16.mxu1 %v6538_v45 }
 0x110   : > { %v6689_v46 = vsub.f32 %v247_v15, %v2036_v6  ;;  %v6715_v36 = vsub.f32 %v265_v28, %v2090_v63 }
 0x111   : > { %5037 = vmatpush3.bf16.msra.mxu0 %v5036_v33  ;;  %v8023_v33 = vand.u32 4294901760, %v6360_v34  ;;  %v2093_v34 = vand.u32 4294901760, %v266_v49 }
 0x112   : > { %5029 = vmatpush3.bf16.msra.mxu1 %v6561_v50  ;;  %5039 = vmatprep.subr.bf16.mxu0 %v5038_v57  ;;  %v6662_v57 = vsub.f32 %v263_v43, %v2084_v51  ;;  %v8029_v43 = vand.u32 4294901760, %v6427_v16  ;;  %v2042_v16 = vand.u32 4294901760, %v249_v26  ;;  %v7820_v28 = vand.u32 4294901760, %v6689_v46 }
 0x113   : > { %5063 = vmatprep.subr.bf16.mxu1 %v6252_v19  ;;  %v5046_v25 = vpack.c.bf16 %v8024_v21, %v8023_v33  ;;  %v8027_v19 = vand.u32 4294901760, %v7998_v0  ;;  %v8031_v0 = vand.u32 4294901760, %v6448_v11  ;;  %v6686_v33 = vsub.f32 %v264_v35, %v2087_v62 }
 0x114   : > { %v6678_v52 = vpack.c.bf16 %v8030_v30, %v8029_v43  ;;  %v8033_v11 = vand.u32 4294901760, %v6464_v58  ;;  %v2096_v35 = vand.u32 4294901760, %v267_v60  ;;  %v7825_v15 = vand.u32 4294901760, %v6662_v57 }
 0x115   : > { %v5050_v18 = vpack.c.bf16 %v8028_v14, %v8027_v19  ;;  %1758 = vmatmul.mubr.f32.vlgmr.msra.gmra.mrb[8].mxu1 %v1277_v4  ;;  %5041 = vmatpush3.bf16.msra.mxu0 %v5040_v39  ;;  %v6684_v10 = vpack.c.bf16 %v8032_v8, %v8031_v0  ;;  %v6691_v4 = vsub.f32 %v248_v23, %v2039_v12  ;;  %v2045_v39 = vand.u32 4294901760, %v250_v40 }
 0x116   : > { %5065 = vmatpush3.bf16.msra.mxu1 %v7994_v29  ;;  %5043 = vmatprep.subr.bf16.mxu0 %v5042_v32  ;;  %v6699_v21 = vpack.c.bf16 %v8034_v13, %v8033_v11  ;;  %v2099_v29 = vand.u32 4294901760, %v268_v17  ;;  %v8035_v23 = vand.u32 4294901760, %v6502_v44  ;;  %v8037_v58 = vand.u32 4294901760, %v6522_v54  ;;  %v251_v44 = vld [vmem:[#allocation5 + $0x220] sm:$0xff] }
 0x117   : > { %5067 = vmatprep.subr.bf16.mxu1 %v7995_v5  ;;  %2028 = vmatprep.mubr.f32.mxu1 %v8014_v2  ;;  %v8036_v5 = vand.u32 4294901760, %v6519_v48  ;;  %v6717_v38 = vsub.f32 %v266_v49, %v2093_v34  ;;  %v6719_v2 = vpack.c.bf16 %v2087_v62, %v2084_v51  ;;  %v6721_v19 = vpack.c.bf16 %v2039_v12, %v2036_v6  ;;  %v269_v62 = vld [vmem:[#allocation5 + $0x2b0] sm:$0xff]  ;;  %v270_v49 = vld [vmem:[#allocation5 + $0x2b8] sm:$0xff] }
 0x118   : > { %v6707_v32 = vpack.c.bf16 %v8035_v23, %v1498_v59  ;;  %v7823_v41 = vand.u32 4294901760, %v6686_v33  ;;  %v252_v59 = vld [vmem:[#allocation5 + $0x228] sm:$0xff]  ;;  %v6724_v14 = vand.u32 4294901760, %v180_v55  ;;  %v6727_v48 = vpack.c.bf16 %v2093_v34, %v2090_v63 }
 0x119   : > { %v6713_v9 = vpack.c.bf16 %v8037_v58, %v8036_v5  ;;  %5045 = vmatpush3.bf16.msra.mxu0 %v5044_v7  ;;  %8038 = vst [vmem:[#allocation11_spill] sm:$0xff] %v6721_v19  ;;  %v6729_v54 = vpack.c.bf16 %v2045_v39, %v2042_v16  ;;  %v7819_v51 = vand.u32 4294901760, %v6691_v4  ;;  %v6734_v6 = vsub.f32 %v249_v26, %v2042_v16 }
 0x11a   : > { %8039 = vst [vmem:[#allocation12_spill] sm:$0xff] %v6724_v14  ;;  %5069 = vmatpush3.bf16.msra.mxu1 %v7997_v24  ;;  %5047 = vmatprep.subr.bf16.mxu0 %v5046_v25  ;;  %8040 = vst [vmem:[#allocation16_spill] sm:$0xff] %v6727_v48  ;;  %v6736_v12 = vsub.f32 %v250_v40, %v2045_v39  ;;  %v6738_v7 = vpack.c.bf16 %v2099_v29, %v2096_v35  ;;  %v2048_v25 = vand.u32 4294901760, %v251_v44 }
 0x11b   : > { %8041 = vst [vmem:[#allocation21_spill] sm:$0xff] %v6729_v54  ;;  %5071 = vmatprep.subr.bf16.mxu1 %v8000_v3  ;;  %v2263_v24 = vsub.f32 %v6662_v57, %v7825_v15  ;;  %v2051_v63 = vand.u32 4294901760, %v252_v59  ;;  %v7816_v34 = vand.u32 4294901760, %v6715_v36  ;;  %v7815_v43 = vand.u32 4294901760, %v6717_v38 }
 0x11c   : > { %8042 = vst [vmem:[#allocation22_spill] sm:$0xff] %v6738_v7  ;;  %v2270_v3 = vsub.f32 %v6686_v33, %v7823_v41  ;;  %v2102_v26 = vand.u32 4294901760, %v269_v62  ;;  %v2105_v40 = vand.u32 4294901760, %v270_v49  ;;  %v6749_v30 = vsub.f32 %v180_v55, %v6724_v14  ;;  %v253_v55 = vld [vmem:[#allocation5 + $0x230] sm:$0xff] }
 0x11d   : > { %5049 = vmatpush3.bf16.msra.mxu0 %v5048_v1  ;;  %v6752_v0 = vsub.f32 %v267_v60, %v2096_v35  ;;  %v2151_v8 = vsub.f32 %v6689_v46, %v7820_v28  ;;  %v2158_v1 = vsub.f32 %v6691_v4, %v7819_v51  ;;  %v6761_v16 = vsub.f32 %v268_v17, %v2099_v29  ;;  %v254_v17 = vld [vmem:[#allocation5 + $0x238] sm:$0xff]  ;;  %v256_v28 = vld [vmem:[#allocation5 + $0x248] sm:$0xff] }
 0x11e   : > { %5073 = vmatpush3.bf16.msra.mxu1 %v8001_v56  ;;  %5051 = vmatprep.subr.bf16.mxu0 %v5050_v18  ;;  %v2264_v39 = vand.u32 4294901760, %v2263_v24  ;;  %v7818_v11 = vand.u32 4294901760, %v6734_v6  ;;  %v7817_v56 = vand.u32 4294901760, %v6736_v12  ;;  %v6765_v18 = vpack.c.bf16 %v2051_v63, %v2048_v25 }
 0x11f   : > { %5075 = vmatprep.subr.bf16.mxu1 %v8002_v53  ;;  %v6767_v60 = vsub.f32 %v251_v44, %v2048_v25  ;;  %v2277_v13 = vsub.f32 %v6715_v36, %v7816_v34  ;;  %v2284_v53 = vsub.f32 %v6717_v38, %v7815_v43  ;;  %v2271_v35 = vand.u32 4294901760, %v2270_v3  ;;  %v271_v43 = vld [vmem:[#allocation5 + $0x2c0] sm:$0xff]  ;;  %v272_v34 = vld [vmem:[#allocation5 + $0x2c8] sm:$0xff] }
 0x120   : > { %8043 = vst [vmem:[#allocation14_spill] sm:$0xff] %v6765_v18  ;;  %v6776_v29 = vsub.f32 %v252_v59, %v2051_v63  ;;  %v6778_v23 = vpack.c.bf16 %v2105_v40, %v2102_v26  ;;  %v7826_v5 = vand.u32 4294901760, %v6749_v30  ;;  %v2152_v58 = vand.u32 4294901760, %v2151_v8  ;;  %v255_v8 = vld [vmem:[#allocation5 + $0x240] sm:$0xff] }
 0x121   : > { %5053 = vmatpush3.bf16.msra.mxu0 %v6678_v52  ;;  %v2159_v44 = vand.u32 4294901760, %v2158_v1  ;;  %v6783_v24 = vsub.f32 %v269_v62, %v2102_v26  ;;  %v2054_v25 = vand.u32 4294901760, %v253_v55  ;;  %v6786_v52 = vsub.f32 %v270_v49, %v2105_v40 }
 0x122   : > { %8044 = vst [vmem:[#allocation15_spill] sm:$0xff] %v6778_v23  ;;  %5077 = vmatpush3.bf16.msra.mxu1 %v8003_v47  ;;  %5055 = vmatprep.subr.bf16.mxu0 %v6684_v10  ;;  %v2057_v59 = vand.u32 4294901760, %v254_v17  ;;  %v2165_v63 = vsub.f32 %v6734_v6, %v7818_v11  ;;  %v2172_v47 = vsub.f32 %v6736_v12, %v7817_v56  ;;  %v2278_v10 = vand.u32 4294901760, %v2277_v13 }
 0x123   : > { %5079 = vmatprep.subr.bf16.mxu1 %v8004_v31  ;;  %v2285_v3 = vand.u32 4294901760, %v2284_v53  ;;  %v7822_v62 = vand.u32 4294901760, %v6752_v0  ;;  %v7821_v26 = vand.u32 4294901760, %v6761_v16  ;;  %v6797_v31 = vpack.c.bf16 %v2271_v35, %v2264_v39 }
 0x124   : > { %v2108_v49 = vand.u32 4294901760, %v271_v43  ;;  %v2111_v40 = vand.u32 4294901760, %v272_v34  ;;  %v2134_v1 = vsub.f32 %v6749_v30, %v7826_v5  ;;  %v6804_v13 = vpack.c.bf16 %v2159_v44, %v2152_v58  ;;  %v274_v44 = vld [vmem:[#allocation5 + $0x2d8] sm:$0xff] }
 0x125   : > { %5057 = vmatpush3.bf16.msra.mxu0 %v6699_v21  ;;  %v6806_v53 = vsub.f32 %v253_v55, %v2054_v25  ;;  %v7824_v56 = vand.u32 4294901760, %v6767_v60  ;;  %v7827_v21 = vand.u32 4294901760, %v6776_v29  ;;  %v6811_v39 = vpack.c.bf16 %v2057_v59, %v2054_v25  ;;  %v258_v5 = vld [vmem:[#allocation5 + $0x258] sm:$0xff] }
 0x126   : > { %5081 = vmatpush3.bf16.msra.mxu1 %v6399_v61  ;;  %5059 = vmatprep.subr.bf16.mxu0 %v6707_v32  ;;  %v6813_v35 = vsub.f32 %v254_v17, %v2057_v59  ;;  %v2166_v11 = vand.u32 4294901760, %v2165_v63  ;;  %v2173_v51 = vand.u32 4294901760, %v2172_v47  ;;  %v6815_v61 = vpack.c.bf16 %v2285_v3, %v2278_v10  ;;  %v273_v17 = vld [vmem:[#allocation5 + $0x2d0] sm:$0xff] }
 0x127   : > { %5083 = vmatprep.subr.bf16.mxu1 %v8007_v37  ;;  %8045 = vst [vmem:[#allocation17_spill] sm:$0xff] %v6811_v39  ;;  %v2291_v32 = vsub.f32 %v6752_v0, %v7822_v62  ;;  %v2298_v55 = vsub.f32 %v6761_v16, %v7821_v26  ;;  %v2060_v58 = vand.u32 4294901760, %v255_v8  ;;  %v6824_v37 = vpack.c.bf16 %v2111_v40, %v2108_v49 }
 0x128   : > { %v7829_v25 = vand.u32 4294901760, %v6783_v24  ;;  %v7828_v59 = vand.u32 4294901760, %v6786_v52  ;;  %v2135_v63 = vand.u32 4294901760, %v2134_v1  ;;  %v6830_v47 = vsub.f32 %v271_v43, %v2108_v49 }
 0x129   : > { %5061 = vmatpush3.bf16.msra.mxu0 %v6713_v9  ;;  %8046 = vst [vmem:[#allocation18_spill] sm:$0xff] %v6824_v37  ;;  %v2063_v10 = vand.u32 4294901760, %v256_v28  ;;  %v2179_v9 = vsub.f32 %v6767_v60, %v7824_v56  ;;  %v2186_v3 = vsub.f32 %v6776_v29, %v7827_v21  ;;  %v6839_v26 = vpack.c.bf16 %v2173_v51, %v2166_v11 }
 0x12a   : > { %5085 = vmatpush3.bf16.msra.mxu1 %v6421_v20  ;;  %5095 = vmatprep.subr.bf16.mxu0 %v6719_v2  ;;  %v6841_v1 = vsub.f32 %v272_v34, %v2111_v40  ;;  %v257_v20 = vld [vmem:[#allocation5 + $0x250] sm:$0xff]  ;;  %v7832_v62 = vand.u32 4294901760, %v6806_v53  ;;  %v7835_v43 = vand.u32 4294901760, %v6813_v35  ;;  %v2292_v49 = vand.u32 4294901760, %v2291_v32 }
 0x12b   : > { %5087 = vmatprep.subr.bf16.mxu1 %v6455_v42  ;;  %v2299_v41 = vand.u32 4294901760, %v2298_v55  ;;  %v2114_v56 = vand.u32 4294901760, %v273_v17  ;;  %v2117_v15 = vand.u32 4294901760, %v274_v44  ;;  %v6847_v21 = vsub.f32 %v255_v8, %v2060_v58 }
 0x12c   : > { %1926 = vmatmul.mubr.f32.vlgmr.msra.gmra.mrb[10].mxu0 %v6479_v27  ;;  %v2305_v42 = vsub.f32 %v6783_v24, %v7829_v25  ;;  %v2312_v51 = vsub.f32 %v6786_v52, %v7828_v59  ;;  %v6857_v34 = vpack.c.bf16 %v2063_v10, %v2060_v58  ;;  %v2180_v11 = vand.u32 4294901760, %v2179_v9  ;;  %v275_v59 = vld [vmem:[#allocation5 + $0x2e0] sm:$0xff] }
 0x12d   : > { %5097 = vmatpush3.bf16.msra.mxu0 %v6721_v19  ;;  %2136 = vmatprep.mubr.f32.mxu0 %v2135_v63  ;;  %v2187_v40 = vand.u32 4294901760, %v2186_v3  ;;  %v2066_v32 = vand.u32 4294901760, %v257_v20  ;;  %v2069_v8 = vand.u32 4294901760, %v258_v5  ;;  %v2193_v55 = vsub.f32 %v6806_v53, %v7832_v62  ;;  %v6885_v25 = vld [vmem:[#allocation5 + $0x260] sm:$0xff] }
 0x12e   : > { %5089 = vmatpush3.bf16.msra.mxu1 %v6536_v22  ;;  %5099 = vmatprep.subr.bf16.mxu0 %v6727_v48  ;;  %v2200_v63 = vsub.f32 %v6813_v35, %v7835_v43  ;;  %v276_v22 = vld [vmem:[#allocation5 + $0x2e8] sm:$0xff]  ;;  %v6867_v58 = vpack.c.bf16 %v2299_v41, %v2292_v49  ;;  %v6869_v9 = vsub.f32 %v256_v28, %v2063_v10  ;;  %v2306_v19 = vand.u32 4294901760, %v2305_v42 }
 0x12f   : > { %5091 = vmatprep.subr.bf16.mxu1 %v6538_v45  ;;  %v6871_v3 = vpack.c.bf16 %v2117_v15, %v2114_v56  ;;  %v7836_v45 = vand.u32 4294901760, %v6841_v1  ;;  %v6875_v48 = vsub.f32 %v273_v17, %v2114_v56  ;;  %v6877_v62 = vsub.f32 %v274_v44, %v2117_v15  ;;  %v6893_v42 = vld [vmem:[#allocation5 + $0x268] sm:$0xff] }
 0x130   : > { %v2313_v43 = vand.u32 4294901760, %v2312_v51  ;;  %v6881_v41 = vpack.c.bf16 %v2187_v40, %v2180_v11  ;;  %v6883_v28 = vsub.f32 %v257_v20, %v2066_v32  ;;  %v2120_v10 = vand.u32 4294901760, %v275_v59  ;;  %v6902_v40 = vld [vmem:[#allocation5 + $0x2f0] sm:$0xff] }
 0x131   : > { %5101 = vmatpush3.bf16.msra.mxu0 %v6729_v54  ;;  %8047 = vst [vmem:[#allocation19_spill] sm:$0xff] %v6875_v48  ;;  %8048 = vst [vmem:[#allocation20_spill] sm:$0xff] %v6877_v62  ;;  %v2123_v49 = vand.u32 4294901760, %v276_v22  ;;  %v6888_v56 = vpack.c.bf16 %v2069_v8, %v2066_v32  ;;  %v2194_v15 = vand.u32 4294901760, %v2193_v55  ;;  %v2201_v17 = vand.u32 4294901760, %v2200_v63  ;;  %v6904_v32 = vld [vmem:[#allocation5 + $0x2f8] sm:$0xff] }
 0x132   : > { %5093 = vmatpush3.bf16.msra.mxu1 %v6561_v50  ;;  %5103 = vmatprep.subr.bf16.mxu0 %v6738_v7  ;;  %v8049_v44 = vand.u32 4294901760, %v6830_v47  ;;  %v6895_v51 = vsub.f32 %v258_v5, %v2069_v8  ;;  %v2326_v20 = vsub.f32 %v6841_v1, %v7836_v45  ;;  %v5138_v55 = vpack.c.bf16 %v2313_v43, %v2306_v19 }
 0x133   : > { %5127 = vmatprep.subr.bf16.mxu1 %v6797_v31  ;;  %v2072_v5 = vand.u32 4294901760, %v6885_v25  ;;  %v6914_v45 = vpack.c.bf16 %v2123_v49, %v2120_v10  ;;  %v6916_v31 = vsub.f32 %v275_v59, %v2120_v10  ;;  %v6918_v11 = vsub.f32 %v276_v22, %v2123_v49 }
 0x134   : > { %v2319_v50 = vsub.f32 %v6830_v47, %v8049_v44  ;;  %v179_v44 = vld [vmem:[%s5827_s29 + $0x20] sm:$0xff]  ;;  %v5140_v19 = vpack.c.bf16 %v2201_v17, %v2194_v15  ;;  %v2126_v8 = vand.u32 4294901760, %v6902_v40  ;;  %v2129_v63 = vand.u32 4294901760, %v6904_v32 }
 0x135   : > { %2030 = vmatmul.mubr.f32.vlgmr.msra.gmra.mrb[10].mxu1 %v6479_v27  ;;  %5105 = vmatpush3.bf16.msra.mxu0 %v6765_v18  ;;  %v2075_v27 = vand.u32 4294901760, %v6893_v42  ;;  %v6924_v18 = vld [vmem:[#allocation5 + $0x270] sm:$0xff]  ;;  %v2327_v59 = vand.u32 4294901760, %v2326_v20  ;;  %v8050_v22 = vand.u32 4294901760, %v6847_v21  ;;  %v8051_v49 = vand.u32 4294901760, %v6869_v9 }
 0x136   : > { %5129 = vmatpush3.bf16.msra.mxu1 %v6804_v13  ;;  %5107 = vmatprep.subr.bf16.mxu0 %v6778_v23  ;;  %v2320_v43 = vand.u32 4294901760, %v2319_v50  ;;  %v6926_v13 = vld [vmem:[#allocation5 + $0x278] sm:$0xff]  ;;  %v6935_v15 = vand.u32 4294901760, %v179_v44  ;;  %v8052_v17 = vand.u32 4294901760, %v6875_v48  ;;  %v8053_v23 = vand.u32 4294901760, %v6877_v62 }
 0x137   : > { %5131 = vmatprep.subr.bf16.mxu1 %v6815_v61  ;;  %2372 = vmatprep.mubr.f32.mxu1 %v6724_v14  ;;  %v2207_v10 = vsub.f32 %v6847_v21, %v8050_v22  ;;  %v2214_v61 = vsub.f32 %v6869_v9, %v8051_v49  ;;  %v6949_v49 = vsub.f32 %v6885_v25, %v2072_v5  ;;  %v2081_v7 = vand.u32 4294901760, %v6926_v13 }
 0x138   : > { %v2333_v50 = vsub.f32 %v6875_v48, %v8052_v17  ;;  %v2340_v20 = vsub.f32 %v6877_v62, %v8053_v23  ;;  %v2078_v17 = vand.u32 4294901760, %v6924_v18  ;;  %v6958_v23 = vsub.f32 %v6902_v40, %v2126_v8 }
 0x139   : > { %5109 = vmatpush3.bf16.msra.mxu0 %v6811_v39  ;;  %v6952_v39 = vsub.f32 %v6893_v42, %v2075_v27  ;;  %v6961_v22 = vsub.f32 %v6904_v32, %v2129_v63  ;;  %v7855_v25 = vand.u32 4294901760, %v6918_v11  ;;  %v5142_v14 = vpack.c.bf16 %v2327_v59, %v2320_v43 }
 0x13a   : > { %5133 = vmatpush3.bf16.msra.mxu1 %v6839_v26  ;;  %5111 = vmatprep.subr.bf16.mxu0 %v6824_v37  ;;  %v2208_v37 = vand.u32 4294901760, %v2207_v10  ;;  %v2215_v42 = vand.u32 4294901760, %v2214_v61  ;;  %v6966_v62 = vsub.f32 %v179_v44, %v6935_v15  ;;  %v2334_v48 = vand.u32 4294901760, %v2333_v50 }
 0x13b   : > { %5135 = vmatprep.subr.bf16.mxu1 %v6867_v58  ;;  %v2341_v58 = vand.u32 4294901760, %v2340_v20  ;;  %v8054_v40 = vand.u32 4294901760, %v6883_v28  ;;  %v8055_v32 = vand.u32 4294901760, %v6895_v51  ;;  %v6978_v43 = vsub.f32 %v6924_v18, %v2078_v17 }
 0x13c   : > { %v6981_v44 = vsub.f32 %v6926_v13, %v2081_v7  ;;  %v8056_v61 = vand.u32 4294901760, %v6916_v31  ;;  %v7857_v18 = vand.u32 4294901760, %v6961_v22  ;;  %v6995_v13 = vpack.c.bf16 %v2129_v63, %v2126_v8 }
 0x13d   : > { %5113 = vmatpush3.bf16.msra.mxu0 %v6857_v34  ;;  %v2221_v54 = vsub.f32 %v6883_v28, %v8054_v40  ;;  %v2228_v26 = vsub.f32 %v6895_v51, %v8055_v32  ;;  %v6993_v40 = vpack.c.bf16 %v2075_v27, %v2072_v5  ;;  %v7859_v32 = vand.u32 4294901760, %v6966_v62 }
 0x13e   : > { %5137 = vmatpush3.bf16.msra.mxu1 %v6881_v41  ;;  %5115 = vmatprep.subr.bf16.mxu0 %v6871_v3  ;;  %v2347_v50 = vsub.f32 %v6916_v31, %v8056_v61  ;;  %v2354_v41 = vsub.f32 %v6918_v11, %v7855_v25  ;;  %v5146_v10 = vpack.c.bf16 %v2341_v58, %v2334_v48  ;;  %v8057_v25 = vand.u32 4294901760, %v6949_v49 }
 0x13f   : > { %5139 = vmatprep.subr.bf16.mxu1 %v5138_v55  ;;  %v5144_v55 = vpack.c.bf16 %v2215_v42, %v2208_v37  ;;  %v2222_v59 = vand.u32 4294901760, %v2221_v54  ;;  %v2229_v61 = vand.u32 4294901760, %v2228_v26  ;;  %v8058_v5 = vand.u32 4294901760, %v6952_v39 }
 0x140   : > { %v2235_v20 = vsub.f32 %v6949_v49, %v8057_v25  ;;  %v7856_v63 = vand.u32 4294901760, %v6978_v43  ;;  %v7858_v27 = vand.u32 4294901760, %v6981_v44  ;;  %v2348_v37 = vand.u32 4294901760, %v2347_v50 }
 0x141   : > { %5117 = vmatpush3.bf16.msra.mxu0 %v6888_v56  ;;  %v2242_v8 = vsub.f32 %v6952_v39, %v8058_v5  ;;  %v2355_v48 = vand.u32 4294901760, %v2354_v41  ;;  %v8059_v54 = vand.u32 4294901760, %v6958_v23  ;;  %v2368_v26 = vsub.f32 %v6961_v22, %v7857_v18 }
 0x142   : > { %5141 = vmatpush3.bf16.msra.mxu1 %v5140_v19  ;;  %5119 = vmatprep.subr.bf16.mxu0 %v6914_v45  ;;  %v2140_v25 = vsub.f32 %v6966_v62, %v7859_v32  ;;  %v7018_v42 = vpack.c.bf16 %v2081_v7, %v2078_v17  ;;  %v5148_v58 = vpack.c.bf16 %v2229_v61, %v2222_v59  ;;  %v2236_v50 = vand.u32 4294901760, %v2235_v20  ;;  %v7093_v32 = vld [vmem:[#allocation5 + $0x300] sm:$0xff] }
 0x143   : > { %5143 = vmatprep.subr.bf16.mxu1 %v5142_v14  ;;  %v2361_v19 = vsub.f32 %v6958_v23, %v8059_v54  ;;  %v5158_v14 = vpack.c.bf16 %v6686_v33, %v6662_v57  ;;  %v2243_v41 = vand.u32 4294901760, %v2242_v8  ;;  %v2249_v5 = vsub.f32 %v6978_v43, %v7856_v63 }
 0x144   : > { %v2256_v54 = vsub.f32 %v6981_v44, %v7858_v27  ;;  %v5150_v7 = vpack.c.bf16 %v2355_v48, %v2348_v37  ;;  %v2369_v59 = vand.u32 4294901760, %v2368_v26  ;;  %v2141_v61 = vand.u32 4294901760, %v2140_v25  ;;  %v8061_v25 = vld [vmem:[#allocation16_spill] sm:$0xff] }
 0x145   : > { %5121 = vmatpush3.bf16.msra.mxu0 %v6993_v40  ;;  %v2362_v17 = vand.u32 4294901760, %v2361_v19  ;;  %v5152_v20 = vpack.c.bf16 %v2243_v41, %v2236_v50  ;;  %v5162_v8 = vpack.c.bf16 %v6717_v38, %v6715_v36  ;;  %v2250_v63 = vand.u32 4294901760, %v2249_v5  ;;  %v8063_v50 = vld [vmem:[#allocation21_spill] sm:$0xff]  ;;  %v8064_v41 = vld [vmem:[#allocation19_spill] sm:$0xff]  ;;  %v8065_v5 = vld [vmem:[#allocation20_spill] sm:$0xff] }
 0x146   : > { %5145 = vmatpush3.bf16.msra.mxu1 %v5144_v55  ;;  %5123 = vmatprep.subr.bf16.mxu0 %v6995_v13  ;;  %v5160_v55 = vpack.c.bf16 %v6691_v4, %v6689_v46  ;;  %v2257_v18 = vand.u32 4294901760, %v2256_v54  ;;  %v5166_v48 = vpack.c.bf16 %v6761_v16, %v6752_v0  ;;  %v5168_v19 = vpack.c.bf16 %v6776_v29, %v6767_v60 }
 0x147   : > { %5147 = vmatprep.subr.bf16.mxu1 %v5146_v10  ;;  %v5154_v27 = vpack.c.bf16 %v2369_v59, %v2362_v17  ;;  %v5164_v10 = vpack.c.bf16 %v6736_v12, %v6734_v6  ;;  %v5170_v26 = vpack.c.bf16 %v6786_v52, %v6783_v24  ;;  %v5178_v54 = vpack.c.bf16 %v8065_v5, %v8064_v41  ;;  %v8067_v59 = vld [vmem:[#allocation14_spill] sm:$0xff] }
 0x148   : > { %v5156_v37 = vpack.c.bf16 %v2257_v18, %v2250_v63  ;;  %v5172_v18 = vpack.c.bf16 %v6813_v35, %v6806_v53  ;;  %v8060_v63 = vld [vmem:[#allocation11_spill] sm:$0xff]  ;;  %v5180_v17 = vpack.c.bf16 %v6895_v51, %v6883_v28 }
 0x149   : > { %5125 = vmatpush3.bf16.msra.mxu0 %v7018_v42 }
 0x14a   : > { %5149 = vmatpush3.bf16.msra.mxu1 %v5148_v58  ;;  %5159 = vmatprep.subr.bf16.mxu0 %v5158_v14  ;;  %v8062_v58 = vand.u32 4294901760, %v6749_v30  ;;  %v5176_v14 = vpack.c.bf16 %v6869_v9, %v6847_v21 }
 0x14b   : > { %5151 = vmatprep.subr.bf16.mxu1 %v5150_v7  ;;  %v8066_v7 = vld [vmem:[#allocation22_spill] sm:$0xff] }
 0x14c   : > { %2142 = vmatmul.mubr.f32.vlgmr.msra.gmra.mrb[12].mxu0 %v2141_v61  ;;  %v8068_v61 = vld [vmem:[#allocation15_spill] sm:$0xff] }
 0x14d   : > { %5161 = vmatpush3.bf16.msra.mxu0 %v5160_v55  ;;  %2509 = vmatprep.mubr.f32.mxu0 %v6749_v30  ;;  %v5182_v30 = vpack.c.bf16 %v6918_v11, %v6916_v31 }
 0x14e   : > { %5153 = vmatpush3.bf16.msra.mxu1 %v5152_v20  ;;  %5163 = vmatprep.subr.bf16.mxu0 %v5162_v8  ;;  %v5184_v8 = vpack.c.bf16 %v6952_v39, %v6949_v49 }
 0x14f   : > { %5155 = vmatprep.subr.bf16.mxu1 %v5154_v27  ;;  %v5174_v27 = vpack.c.bf16 %v6841_v1, %v6830_v47 }
 0x151   : > { %5165 = vmatpush3.bf16.msra.mxu0 %v5164_v10 }
 0x152   : > { %5157 = vmatpush3.bf16.msra.mxu1 %v5156_v37  ;;  %5167 = vmatprep.subr.bf16.mxu0 %v5166_v48  ;;  %v8069_v37 = vld [vmem:[#allocation17_spill] sm:$0xff]  ;;  %v5186_v48 = vpack.c.bf16 %v6961_v22, %v6958_v23 }
 0x153   : > { %5191 = vmatprep.subr.bf16.mxu1 %v6719_v2 }
 0x155   : > { %2374 = vmatmul.mubr.f32.vlgmr.msra.gmra.mrb[12].mxu1 %v6935_v15  ;;  %5169 = vmatpush3.bf16.msra.mxu0 %v5168_v19  ;;  %v8070_v19 = vld [vmem:[#allocation18_spill] sm:$0xff] }
 0x156   : > { %5193 = vmatpush3.bf16.msra.mxu1 %v8060_v63  ;;  %5171 = vmatprep.subr.bf16.mxu0 %v5170_v26  ;;  %v5188_v26 = vpack.c.bf16 %v6981_v44, %v6978_v43 }
 0x157   : > { %5195 = vmatprep.subr.bf16.mxu1 %v8061_v25  ;;  %2616 = vmatprep.mubr.f32.mxu1 %v8062_v58 }
 0x159   : > { %5173 = vmatpush3.bf16.msra.mxu0 %v5172_v18  ;;  %v8071_v18 = vand.u32 4294901760, %v6662_v57  ;;  %v8075_v57 = vand.u32 4294901760, %v6715_v36  ;;  %v8077_v36 = vand.u32 4294901760, %v6734_v6 }
 0x15a   : > { %5197 = vmatpush3.bf16.msra.mxu1 %v8063_v50  ;;  %5175 = vmatprep.subr.bf16.mxu0 %v5174_v27  ;;  %v8072_v27 = vand.u32 4294901760, %v6686_v33  ;;  %v8076_v33 = vand.u32 4294901760, %v6717_v38  ;;  %v8078_v38 = vand.u32 4294901760, %v6736_v12 }
 0x15b   : > { %5199 = vmatprep.subr.bf16.mxu1 %v8066_v7 }
 0x15c   : > { %v5222_v58 = vpack.c.bf16 %v8072_v27, %v8071_v18  ;;  %v5226_v18 = vpack.c.bf16 %v8076_v33, %v8075_v57  ;;  %v8083_v57 = vand.u32 4294901760, %v6776_v29 }
 0x15d   : > { %5177 = vmatpush3.bf16.msra.mxu0 %v5176_v14  ;;  %v7079_v14 = vld [vmem:[#allocation5 + $0x380] sm:$0xff] }
 0x15e   : > { %5201 = vmatpush3.bf16.msra.mxu1 %v8067_v59  ;;  %5179 = vmatprep.subr.bf16.mxu0 %v5178_v54  ;;  %v7863_v27 = vand.u32 4294901760, %v7079_v14 }
 0x15f   : > { %5203 = vmatprep.subr.bf16.mxu1 %v8068_v61  ;;  %v3902_v55 = vpop.f32.mrb[0].mxu0 }
 0x160   : > { %v3903_v20 = vpop.f32.mrb[1].mxu0 }
 0x161   : > { %5181 = vmatpush3.bf16.msra.mxu0 %v5180_v17  ;;  %v3904_v10 = vadd.f32 %v3903_v20, %v3902_v55  ;;  %v7081_v17 = vld [vmem:[#allocation5 + $0x388] sm:$0xff]  ;;  %v8073_v55 = vand.u32 4294901760, %v6689_v46  ;;  %v8074_v20 = vand.u32 4294901760, %v6691_v4 }
 0x162   : > { %5205 = vmatpush3.bf16.msra.mxu1 %v8069_v37  ;;  %5183 = vmatprep.subr.bf16.mxu0 %v5182_v30  ;;  %v7862_v46 = vand.u32 4294901760, %v7081_v17 }
 0x163   : > { %5207 = vmatprep.subr.bf16.mxu1 %v8070_v19 }
 0x164   : > { %v7123_v12 = vsub.f32 %v7081_v17, %v7862_v46 }
 0x165   : > { %5185 = vmatpush3.bf16.msra.mxu0 %v5184_v8  ;;  %v5224_v8 = vpack.c.bf16 %v8074_v20, %v8073_v55  ;;  %v8080_v55 = vand.u32 4294901760, %v6752_v0  ;;  %v7127_v0 = vld [vmem:[#allocation5 + $0x398] sm:$0xff] }
 0x166   : > { %5209 = vmatpush3.bf16.msra.mxu1 %v6857_v34  ;;  %5187 = vmatprep.subr.bf16.mxu0 %v5186_v48 }
 0x167   : > { %5211 = vmatprep.subr.bf16.mxu1 %v6871_v3 }
 0x168   : > { %v3937_v54 = vpop.f32.mrb[0].mxu1 }
 0x169   : > { %v3938_v30 = vpop.f32.mrb[1].mxu1  ;;  %5189 = vmatpush3.bf16.msra.mxu0 %v5188_v26  ;;  %v7097_v26 = vld [vmem:[#allocation5 + $0x308] sm:$0xff] }
 0x16a   : > { %v3939_v48 = vadd.f32 %v3938_v30, %v3937_v54  ;;  %5213 = vmatpush3.bf16.msra.mxu1 %v6888_v56  ;;  %5223 = vmatprep.subr.bf16.mxu0 %v5222_v58  ;;  %v5228_v58 = vpack.c.bf16 %v8078_v38, %v8077_v36  ;;  %v8079_v54 = vld [vmem:[#allocation12_spill] sm:$0xff]  ;;  %v7861_v30 = vand.u32 4294901760, %v7093_v32  ;;  %v7860_v6 = vand.u32 4294901760, %v7097_v26  ;;  %v281_v36 = vld [vmem:[#allocation5 + $0x310] sm:$0xff] }
 0x16b   : > { %5215 = vmatprep.subr.bf16.mxu1 %v6914_v45  ;;  %v8084_v38 = vand.u32 4294901760, %v6783_v24  ;;  %v8086_v24 = vand.u32 4294901760, %v6806_v53  ;;  %v2904_v46 = vand.u32 4294901760, %v281_v36  ;;  %v8093_v53 = vand.u32 4294901760, %v8064_v41  ;;  %v300_v41 = vld [vmem:[#allocation5 + $0x3a8] sm:$0xff] }
 0x16c   : > { %v7099_v4 = vadd.f32 %v3939_v48, %v3904_v10  ;;  %2512 = vmatmul.mubr.f32.vlgmr.msra.gmra.mrb[14].mxu0 %v6966_v62  ;;  %v8081_v10 = vand.u32 4294901760, %v6761_v16  ;;  %v7125_v48 = vld [vmem:[#allocation5 + $0x390] sm:$0xff]  ;;  %v8082_v16 = vand.u32 4294901760, %v6767_v60  ;;  %v7146_v60 = vsub.f32 %v7097_v26, %v7860_v6 }
 0x16d   : > { %5225 = vmatpush3.bf16.msra.mxu0 %v5224_v8  ;;  %2786 = vmatprep.mubr.f32.mxu0 %v8079_v54  ;;  %v7116_v8 = vsub.f32 %v7079_v14, %v7863_v27  ;;  %v2952_v29 = vand.u32 4294901760, %v7125_v48  ;;  %v8089_v6 = vand.u32 4294901760, %v6841_v1  ;;  %v8090_v27 = vand.u32 4294901760, %v6966_v62 }
 0x16e   : > { %5217 = vmatpush3.bf16.msra.mxu1 %v6993_v40  ;;  %5227 = vmatprep.subr.bf16.mxu0 %v5226_v18  ;;  %v5230_v20 = vpack.c.bf16 %v8081_v10, %v8080_v55  ;;  %v5232_v33 = vpack.c.bf16 %v8083_v57, %v8082_v16  ;;  %v7136_v18 = vsub.f32 %v7093_v32, %v7861_v30  ;;  %v8085_v55 = vand.u32 4294901760, %v6786_v52  ;;  %v282_v57 = vld [vmem:[#allocation5 + $0x318] sm:$0xff] }
 0x16f   : > { %5219 = vmatprep.subr.bf16.mxu1 %v6995_v13  ;;  %v2955_v16 = vand.u32 4294901760, %v7127_v0  ;;  %v8087_v52 = vand.u32 4294901760, %v6813_v35  ;;  %v8094_v35 = vand.u32 4294901760, %v8065_v5  ;;  %v8096_v1 = vand.u32 4294901760, %v6895_v51  ;;  %v182_v51 = vld [vmem:[%s5827_s29 + $0x38] sm:$0xff] }
 0x170   : > { %v5234_v10 = vpack.c.bf16 %v8085_v55, %v8084_v38  ;;  %v8088_v55 = vand.u32 4294901760, %v6830_v47  ;;  %v8095_v47 = vand.u32 4294901760, %v6883_v28  ;;  %v7873_v62 = vand.u32 4294901760, %v7136_v18 }
 0x171   : > { %5229 = vmatpush3.bf16.msra.mxu0 %v5228_v58  ;;  %v5236_v38 = vpack.c.bf16 %v8087_v52, %v8086_v24  ;;  %v5242_v24 = vpack.c.bf16 %v8094_v35, %v8093_v53  ;;  %v8097_v5 = vand.u32 4294901760, %v7116_v8  ;;  %v7864_v28 = vand.u32 4294901760, %v7146_v60 }
 0x172   : > { %5221 = vmatpush3.bf16.msra.mxu1 %v7018_v42  ;;  %5231 = vmatprep.subr.bf16.mxu0 %v5230_v20  ;;  %v5238_v30 = vpack.c.bf16 %v8089_v6, %v8088_v55  ;;  %v8092_v20 = vand.u32 4294901760, %v6869_v9  ;;  %v7175_v6 = vpack.c.bf16 %v8096_v1, %v8095_v47  ;;  %v2907_v9 = vand.u32 4294901760, %v282_v57 }
 0x173   : > { %5255 = vmatprep.subr.bf16.mxu1 %v6719_v2  ;;  %v8091_v2 = vand.u32 4294901760, %v6847_v21  ;;  %v7180_v21 = vsub.f32 %v7125_v48, %v2952_v29  ;;  %v7195_v48 = vsub.f32 %v7127_v0, %v2955_v16  ;;  %v8100_v52 = vand.u32 4294901760, %v7123_v12 }
 0x174   : > { %v8102_v53 = vand.u32 4294901760, %v6952_v39  ;;  %v8105_v0 = vand.u32 4294901760, %v6978_v43  ;;  %v7219_v1 = vsub.f32 %v281_v36, %v2904_v46  ;;  %v7227_v43 = vsub.f32 %v282_v57, %v2907_v9 }
 0x175   : > { %2620 = vmatmul.mubr.f32.vlgmr.msra.gmra.mrb[14].mxu1 %v8090_v27  ;;  %5233 = vmatpush3.bf16.msra.mxu0 %v5232_v33  ;;  %v5240_v58 = vpack.c.bf16 %v8092_v20, %v8091_v2  ;;  %v299_v27 = vld [vmem:[#allocation5 + $0x3a0] sm:$0xff]  ;;  %v3125_v33 = vsub.f32 %v7116_v8, %v8097_v5  ;;  %v8098_v20 = vand.u32 4294901760, %v6916_v31  ;;  %v3132_v55 = vsub.f32 %v7123_v12, %v8100_v52 }
 0x176   : > { %5257 = vmatpush3.bf16.msra.mxu1 %v8060_v63  ;;  %5235 = vmatprep.subr.bf16.mxu0 %v5234_v10  ;;  %v8099_v63 = vand.u32 4294901760, %v6918_v11  ;;  %v8101_v2 = vand.u32 4294901760, %v6949_v49  ;;  %v8103_v31 = vand.u32 4294901760, %v6958_v23  ;;  %v8104_v11 = vand.u32 4294901760, %v6961_v22  ;;  %v283_v5 = vld [vmem:[#allocation5 + $0x320] sm:$0xff]  ;;  %v284_v49 = vld [vmem:[#allocation5 + $0x328] sm:$0xff] }
 0x177   : > { %5259 = vmatprep.subr.bf16.mxu1 %v8061_v25  ;;  %2890 = vmatprep.mubr.f32.mxu1 %v8079_v54  ;;  %v8106_v54 = vand.u32 4294901760, %v6981_v44  ;;  %v2958_v39 = vand.u32 4294901760, %v299_v27  ;;  %v3013_v23 = vsub.f32 %v7136_v18, %v7873_v62  ;;  %v7224_v22 = vand.u32 4294901760, %v182_v51 }
 0x178   : > { %v7192_v10 = vpack.c.bf16 %v8099_v63, %v8098_v20  ;;  %v7205_v25 = vpack.c.bf16 %v8102_v53, %v8101_v2  ;;  %v7211_v35 = vpack.c.bf16 %v8104_v11, %v8103_v31  ;;  %v2961_v20 = vand.u32 4294901760, %v300_v41 }
 0x179   : > { %v7217_v47 = vpack.c.bf16 %v8106_v54, %v8105_v0  ;;  %5237 = vmatpush3.bf16.msra.mxu0 %v5236_v38  ;;  %8107 = vst [vmem:[#allocation13_spill] sm:$0xff] %v7224_v22  ;;  %v3126_v44 = vand.u32 4294901760, %v3125_v33  ;;  %v3020_v36 = vsub.f32 %v7146_v60, %v7864_v28  ;;  %v7868_v38 = vand.u32 4294901760, %v7180_v21  ;;  %v301_v28 = vld [vmem:[#allocation5 + $0x3b0] sm:$0xff] }
 0x17a   : > { %5261 = vmatpush3.bf16.msra.mxu1 %v8063_v50  ;;  %5239 = vmatprep.subr.bf16.mxu0 %v5238_v30  ;;  %v3133_v63 = vand.u32 4294901760, %v3132_v55  ;;  %v2910_v52 = vand.u32 4294901760, %v283_v5  ;;  %v2913_v2 = vand.u32 4294901760, %v284_v49  ;;  %v7865_v53 = vand.u32 4294901760, %v7195_v48 }
 0x17b   : > { %5263 = vmatprep.subr.bf16.mxu1 %v8066_v7  ;;  %v8108_v31 = vand.u32 4294901760, %v7079_v14  ;;  %v8109_v50 = vand.u32 4294901760, %v7081_v17  ;;  %v8111_v57 = vand.u32 4294901760, %v7093_v32  ;;  %v8112_v33 = vand.u32 4294901760, %v7097_v26  ;;  %v302_v17 = vld [vmem:[#allocation5 + $0x3b8] sm:$0xff]  ;;  %v285_v26 = vld [vmem:[#allocation5 + $0x330] sm:$0xff] }
 0x17c   : > { %v7247_v0 = vpack.c.bf16 %v2955_v16, %v2952_v29  ;;  %v7249_v7 = vpack.c.bf16 %v2907_v9, %v2904_v46  ;;  %v7251_v55 = vpack.c.bf16 %v2961_v20, %v2958_v39  ;;  %v7253_v54 = vsub.f32 %v299_v27, %v2958_v39  ;;  %v286_v29 = vld [vmem:[#allocation5 + $0x338] sm:$0xff] }
 0x17d   : > { %v7239_v30 = vpack.c.bf16 %v8109_v50, %v8108_v31  ;;  %v7245_v11 = vpack.c.bf16 %v8112_v33, %v8111_v57  ;;  %5241 = vmatpush3.bf16.msra.mxu0 %v5240_v58  ;;  %v3014_v14 = vand.u32 4294901760, %v3013_v23  ;;  %v7256_v31 = vsub.f32 %v182_v51, %v7224_v22 }
 0x17e   : > { %8114 = vst [vmem:[#allocation21_spill] sm:$0xff] %v7247_v0  ;;  %8115 = vst [vmem:[#allocation19_spill] sm:$0xff] %v7251_v55  ;;  %5265 = vmatpush3.bf16.msra.mxu1 %v8067_v59  ;;  %5243 = vmatprep.subr.bf16.mxu0 %v5242_v24  ;;  %v3021_v32 = vand.u32 4294901760, %v3020_v36  ;;  %v3139_v46 = vsub.f32 %v7180_v21, %v7868_v38  ;;  %v7867_v58 = vand.u32 4294901760, %v7219_v1  ;;  %v7866_v16 = vand.u32 4294901760, %v7227_v43 }
 0x17f   : > { %8110 = vst [vmem:[#allocation11_spill] sm:$0xff] %v7239_v30  ;;  %8113 = vst [vmem:[#allocation16_spill] sm:$0xff] %v7245_v11  ;;  %v3972_v9 = vpop.f32.mrb[2].mxu0  ;;  %5267 = vmatprep.subr.bf16.mxu1 %v8068_v61  ;;  %v7265_v27 = vsub.f32 %v300_v41, %v2961_v20  ;;  %v7267_v51 = vpack.c.bf16 %v3133_v63, %v3126_v44  ;;  %v7269_v59 = vpack.c.bf16 %v2913_v2, %v2910_v52  ;;  %v303_v20 = vld [vmem:[#allocation5 + $0x3c0] sm:$0xff]  ;;  %v304_v44 = vld [vmem:[#allocation5 + $0x3c8] sm:$0xff] }
 0x180   : > { %v3146_v24 = vsub.f32 %v7195_v48, %v7865_v53  ;;  %v3973_v39 = vpop.f32.mrb[3].mxu0  ;;  %v7274_v23 = vsub.f32 %v283_v5, %v2910_v52  ;;  %v7276_v36 = vsub.f32 %v284_v49, %v2913_v2  ;;  %v2964_v50 = vand.u32 4294901760, %v301_v28 }
 0x181   : > { %8116 = vst [vmem:[#allocation20_spill] sm:$0xff] %v7269_v59  ;;  %v2967_v57 = vand.u32 4294901760, %v302_v17  ;;  %v3974_v33 = vadd.f32 %v3973_v39, %v3972_v9  ;;  %5245 = vmatpush3.bf16.msra.mxu0 %v7175_v6  ;;  %v2916_v61 = vand.u32 4294901760, %v285_v26  ;;  %v2919_v41 = vand.u32 4294901760, %v286_v29 }
 0x182   : > { %v7874_v63 = vand.u32 4294901760, %v7256_v31  ;;  %5269 = vmatpush3.bf16.msra.mxu1 %v8069_v37  ;;  %5247 = vmatprep.subr.bf16.mxu0 %v7192_v10  ;;  %v7282_v53 = vpack.c.bf16 %v3021_v32, %v3014_v14  ;;  %v3140_v5 = vand.u32 4294901760, %v3139_v46  ;;  %v3027_v49 = vsub.f32 %v7219_v1, %v7867_v58 }
 0x183   : > { %v3034_v6 = vsub.f32 %v7227_v43, %v7866_v16  ;;  %v790_v52 = vadd.f32 %v3974_v33, %v7099_v4  ;;  %5271 = vmatprep.subr.bf16.mxu1 %v8070_v19  ;;  %v3147_v2 = vand.u32 4294901760, %v3146_v24  ;;  %v7871_v37 = vand.u32 4294901760, %v7253_v54  ;;  %v7302_v4 = vld [vmem:[#allocation5 + $0x340] sm:$0xff] }
 0x184   : > { %v7869_v10 = vand.u32 4294901760, %v7265_v27  ;;  %v7294_v14 = vpack.c.bf16 %v2967_v57, %v2964_v50  ;;  %v2970_v32 = vand.u32 4294901760, %v303_v20  ;;  %v2973_v46 = vand.u32 4294901760, %v304_v44 }
 0x185   : > { %v7870_v9 = vand.u32 4294901760, %v7274_v23  ;;  %5249 = vmatpush3.bf16.msra.mxu0 %v7205_v25  ;;  %v7298_v39 = vsub.f32 %v301_v28, %v2964_v50  ;;  %v7300_v16 = vsub.f32 %v302_v17, %v2967_v57  ;;  %v7872_v19 = vand.u32 4294901760, %v7276_v36 }
 0x186   : > { %8117 = vst [vmem:[#allocation22_spill] sm:$0xff] %v7294_v14  ;;  %v2996_v24 = vsub.f32 %v7256_v31, %v7874_v63  ;;  %5273 = vmatpush3.bf16.msra.mxu1 %v6857_v34  ;;  %5251 = vmatprep.subr.bf16.mxu0 %v7211_v35  ;;  %v7310_v33 = vpack.c.bf16 %v2919_v41, %v2916_v61  ;;  %v3028_v25 = vand.u32 4294901760, %v3027_v49  ;;  %v3035_v50 = vand.u32 4294901760, %v3034_v6  ;;  %v305_v49 = vld [vmem:[#allocation5 + $0x3d0] sm:$0xff]  ;;  %v306_v6 = vld [vmem:[#allocation5 + $0x3d8] sm:$0xff] }
 0x187   : > { %v7312_v58 = vsub.f32 %v285_v26, %v2916_v61  ;;  %v7314_v28 = vsub.f32 %v286_v29, %v2919_v41  ;;  %5275 = vmatprep.subr.bf16.mxu1 %v6871_v3  ;;  %v7317_v17 = vpack.c.bf16 %v3147_v2, %v3140_v5  ;;  %v3153_v57 = vsub.f32 %v7253_v54, %v7871_v37  ;;  %v288_v29 = vld [vmem:[#allocation5 + $0x348] sm:$0xff] }
 0x188   : > { %8118 = vst [vmem:[#allocation14_spill] sm:$0xff] %v7310_v33  ;;  %v3160_v34 = vsub.f32 %v7265_v27, %v7869_v10  ;;  %v4007_v35 = vpop.f32.mrb[2].mxu1  ;;  %v7325_v38 = vpack.c.bf16 %v2973_v46, %v2970_v32  ;;  %v7327_v26 = vsub.f32 %v303_v20, %v2970_v32  ;;  %v2922_v61 = vand.u32 4294901760, %v7302_v4  ;;  %v289_v20 = vld [vmem:[#allocation5 + $0x350] sm:$0xff] }
 0x189   : > { %8119 = vst [vmem:[#allocation15_spill] sm:$0xff] %v7312_v58  ;;  %8120 = vst [vmem:[#allocation17_spill] sm:$0xff] %v7314_v28  ;;  %v3041_v3 = vsub.f32 %v7274_v23, %v7870_v9  ;;  %v4008_v41 = vpop.f32.mrb[3].mxu1  ;;  %5253 = vmatpush3.bf16.msra.mxu0 %v7217_v47  ;;  %v3048_v5 = vsub.f32 %v7276_v36, %v7872_v19  ;;  %v2997_v32 = vand.u32 4294901760, %v2996_v24  ;;  %v7881_v47 = vand.u32 4294901760, %v7312_v58  ;;  %v290_v24 = vld [vmem:[#allocation5 + $0x358] sm:$0xff] }
 0x18a   : > { %8121 = vst [vmem:[#allocation18_spill] sm:$0xff] %v7325_v38  ;;  %v4009_v10 = vadd.f32 %v4008_v41, %v4007_v35  ;;  %5277 = vmatpush3.bf16.msra.mxu1 %v6888_v56  ;;  %5287 = vmatprep.subr.bf16.mxu0 %v7239_v30  ;;  %v7341_v9 = vsub.f32 %v304_v44, %v2973_v46  ;;  %v7884_v37 = vand.u32 4294901760, %v7314_v28  ;;  %v3154_v62 = vand.u32 4294901760, %v3153_v57 }
 0x18b   : > { %5279 = vmatprep.subr.bf16.mxu1 %v6914_v45  ;;  %v7346_v19 = vpack.c.bf16 %v3035_v50, %v3028_v25  ;;  %v3161_v63 = vand.u32 4294901760, %v3160_v34  ;;  %v2925_v2 = vand.u32 4294901760, %v288_v29  ;;  %v7352_v56 = vsub.f32 %v7302_v4, %v2922_v61 }
 0x18c   : > { %v7348_v35 = vadd.f32 %v4009_v10, %v790_v52  ;;  %2788 = vmatmul.mubr.f32.vlgmr.msra.gmra.mrb[16].mxu0 %v6935_v15  ;;  %v2976_v44 = vand.u32 4294901760, %v305_v49  ;;  %v2979_v46 = vand.u32 4294901760, %v306_v6  ;;  %v3042_v41 = vand.u32 4294901760, %v3041_v3  ;;  %v307_v10 = vld [vmem:[#allocation5 + $0x3e0] sm:$0xff] }
 0x18d   : > { %5289 = vmatpush3.bf16.msra.mxu0 %v7245_v11  ;;  %v3049_v45 = vand.u32 4294901760, %v3048_v5  ;;  %v8122_v25 = vand.u32 4294901760, %v7298_v39  ;;  %v8123_v57 = vand.u32 4294901760, %v7300_v16  ;;  %2998 = vmatprep.mubr.f32.mxu0 %v2997_v32  ;;  %v2928_v4 = vand.u32 4294901760, %v289_v20 }
 0x18e   : > { %5281 = vmatpush3.bf16.msra.mxu1 %v6993_v40  ;;  %5291 = vmatprep.subr.bf16.mxu0 %v7247_v0  ;;  %v2931_v34 = vand.u32 4294901760, %v290_v24  ;;  %v3055_v3 = vsub.f32 %v7312_v58, %v7881_v47  ;;  %v3062_v5 = vsub.f32 %v7314_v28, %v7884_v37  ;;  %v7372_v32 = vpack.c.bf16 %v2925_v2, %v2922_v61 }
 0x18f   : > { %v3167_v50 = vsub.f32 %v7298_v39, %v8122_v25  ;;  %v3174_v52 = vsub.f32 %v7300_v16, %v8123_v57  ;;  %v308_v25 = vld [vmem:[#allocation5 + $0x3e8] sm:$0xff]  ;;  %5283 = vmatprep.subr.bf16.mxu1 %v6995_v13  ;;  %v7370_v57 = vpack.c.bf16 %v3161_v63, %v3154_v62  ;;  %v7374_v40 = vsub.f32 %v288_v29, %v2925_v2 }
 0x190   : > { %8124 = vst [vmem:[#allocation12_spill] sm:$0xff] %v7372_v32  ;;  %v7887_v0 = vand.u32 4294901760, %v7327_v26  ;;  %v7377_v11 = vpack.c.bf16 %v2979_v46, %v2976_v44  ;;  %v7379_v30 = vsub.f32 %v305_v49, %v2976_v44  ;;  %v7381_v47 = vsub.f32 %v306_v6, %v2979_v46  ;;  %v292_v46 = vld [vmem:[#allocation5 + $0x368] sm:$0xff] }
 0x191   : > { %v2982_v58 = vand.u32 4294901760, %v307_v10  ;;  %5293 = vmatpush3.bf16.msra.mxu0 %v7249_v7  ;;  %v3168_v37 = vand.u32 4294901760, %v3167_v50  ;;  %v3175_v28 = vand.u32 4294901760, %v3174_v52  ;;  %v2985_v13 = vand.u32 4294901760, %v308_v25  ;;  %v7405_v52 = vld [vmem:[#allocation5 + $0x3f0] sm:$0xff] }
 0x192   : > { %8125 = vst [vmem:[#allocation23_spill] sm:$0xff] %v7377_v11  ;;  %v7888_v62 = vand.u32 4294901760, %v7341_v9  ;;  %5285 = vmatpush3.bf16.msra.mxu1 %v7018_v42  ;;  %5295 = vmatprep.subr.bf16.mxu0 %v7251_v55  ;;  %v7387_v63 = vpack.c.bf16 %v3049_v45, %v3042_v41  ;;  %v7389_v29 = vpack.c.bf16 %v2931_v34, %v2928_v4  ;;  %v3056_v61 = vand.u32 4294901760, %v3055_v3  ;;  %v291_v42 = vld [vmem:[#allocation5 + $0x360] sm:$0xff]  ;;  %v181_v3 = vld [vmem:[%s5827_s29 + $0x30] sm:$0xff] }
 0x193   : > { %v3063_v49 = vand.u32 4294901760, %v3062_v5  ;;  %5319 = vmatprep.subr.bf16.mxu1 %v7267_v51  ;;  %v7392_v6 = vsub.f32 %v289_v20, %v2928_v4  ;;  %v7394_v2 = vsub.f32 %v290_v24, %v2931_v34  ;;  %v7399_v44 = vsub.f32 %v7327_v26, %v7887_v0  ;;  %v7407_v51 = vld [vmem:[#allocation5 + $0x3f8] sm:$0xff] }
 0x194   : > { %v7889_v41 = vand.u32 4294901760, %v7352_v56  ;;  %v7402_v45 = vsub.f32 %v307_v10, %v2982_v58  ;;  %v7896_v50 = vand.u32 4294901760, %v7374_v40  ;;  %v5330_v4 = vpack.c.bf16 %v3175_v28, %v3168_v37 }
 0x195   : > { %8126 = vst [vmem:[#allocation24_spill] sm:$0xff] %v7394_v2  ;;  %2892 = vmatmul.mubr.f32.vlgmr.msra.gmra.mrb[16].mxu1 %v6935_v15  ;;  %5297 = vmatpush3.bf16.msra.mxu0 %v7269_v59  ;;  %v7413_v34 = vpack.c.bf16 %v2985_v13, %v2982_v58  ;;  %v3188_v10 = vsub.f32 %v7341_v9, %v7888_v62  ;;  %v2934_v24 = vand.u32 4294901760, %v291_v42  ;;  %v2937_v20 = vand.u32 4294901760, %v292_v46  ;;  %v7432_v62 = vld [vmem:[#allocation5 + $0x378] sm:$0xff] }
 0x196   : > { %8127 = vst [vmem:[#allocation25_spill] sm:$0xff] %v7402_v45  ;;  %5321 = vmatpush3.bf16.msra.mxu1 %v7282_v53  ;;  %5299 = vmatprep.subr.bf16.mxu0 %v7294_v14  ;;  %v5332_v5 = vpack.c.bf16 %v3063_v49, %v3056_v61  ;;  %v7421_v0 = vsub.f32 %v308_v25, %v2985_v13  ;;  %v3182_v15 = vand.u32 4294901760, %v7399_v44  ;;  %v2988_v37 = vand.u32 4294901760, %v7405_v52  ;;  %v7430_v53 = vld [vmem:[#allocation5 + $0x370] sm:$0xff] }
 0x197   : > { %5323 = vmatprep.subr.bf16.mxu1 %v7317_v17  ;;  %v3069_v58 = vsub.f32 %v7352_v56, %v7889_v41  ;;  %v2991_v28 = vand.u32 4294901760, %v7407_v51  ;;  %3234 = vmatprep.mubr.f32.mxu1 %v7224_v22  ;;  %v3076_v17 = vsub.f32 %v7374_v40, %v7896_v50  ;;  %v8128_v25 = vand.u32 4294901760, %v7379_v30 }
 0x198   : > { %v8129_v61 = vand.u32 4294901760, %v7381_v47  ;;  %v7444_v44 = vand.u32 4294901760, %v181_v3  ;;  %v3189_v41 = vand.u32 4294901760, %v3188_v10  ;;  %v7454_v50 = vsub.f32 %v292_v46, %v2937_v20 }
 0x199   : > { %v3195_v13 = vsub.f32 %v7379_v30, %v8128_v25  ;;  %5301 = vmatpush3.bf16.msra.mxu0 %v7310_v33  ;;  %v7452_v25 = vsub.f32 %v291_v42, %v2934_v24  ;;  %v2943_v55 = vand.u32 4294901760, %v7432_v62  ;;  %v3070_v10 = vand.u32 4294901760, %v3069_v58 }
 0x19a   : > { %v3202_v49 = vsub.f32 %v7381_v47, %v8129_v61  ;;  %5325 = vmatpush3.bf16.msra.mxu1 %v7346_v19  ;;  %5303 = vmatprep.subr.bf16.mxu0 %v7325_v38  ;;  %v2940_v61 = vand.u32 4294901760, %v7430_v53  ;;  %v7460_v14 = vsub.f32 %v7405_v52, %v2988_v37  ;;  %v7463_v59 = vsub.f32 %v7407_v51, %v2991_v28 }
 0x19b   : > { %5327 = vmatprep.subr.bf16.mxu1 %v7370_v57  ;;  %v3077_v22 = vand.u32 4294901760, %v3076_v17  ;;  %v3196_v42 = vand.u32 4294901760, %v3195_v13  ;;  %v7467_v46 = vsub.f32 %v181_v3, %v7444_v44  ;;  %v7470_v33 = vpack.c.bf16 %v2937_v20, %v2934_v24 }
 0x19c   : > { %v3203_v38 = vand.u32 4294901760, %v3202_v49  ;;  %v8130_v57 = vand.u32 4294901760, %v7392_v6  ;;  %v8131_v58 = vand.u32 4294901760, %v7394_v2  ;;  %v8132_v19 = vand.u32 4294901760, %v7402_v45 }
 0x19d   : > { %5305 = vmatpush3.bf16.msra.mxu0 %v7372_v32  ;;  %v7484_v3 = vsub.f32 %v7430_v53, %v2940_v61  ;;  %v7487_v20 = vsub.f32 %v7432_v62, %v2943_v55  ;;  %v3103_v13 = vand.u32 4294901760, %v7454_v50  ;;  %v5336_v32 = vpack.c.bf16 %v3077_v22, %v3070_v10 }
 0x19e   : > { %v3083_v52 = vsub.f32 %v7392_v6, %v8130_v57  ;;  %v3090_v51 = vsub.f32 %v7394_v2, %v8131_v58  ;;  %v3209_v17 = vsub.f32 %v7402_v45, %v8132_v19  ;;  %5329 = vmatpush3.bf16.msra.mxu1 %v7387_v63  ;;  %5307 = vmatprep.subr.bf16.mxu0 %v7377_v11  ;;  %v8133_v58 = vand.u32 4294901760, %v7421_v0 }
 0x19f   : > { %v4042_v49 = vpop.f32.mrb[4].mxu0  ;;  %5331 = vmatprep.subr.bf16.mxu1 %v5330_v4  ;;  %v5334_v57 = vpack.c.bf16 %v3189_v41, %v3182_v15  ;;  %v7913_v63 = vand.u32 4294901760, %v7460_v14  ;;  %v7496_v45 = vpack.c.bf16 %v2991_v28, %v2988_v37  ;;  %v5338_v62 = vpack.c.bf16 %v3203_v38, %v3196_v42 }
 0x1a0   : > { %v3216_v19 = vsub.f32 %v7421_v0, %v8133_v58  ;;  %v4043_v53 = vpop.f32.mrb[5].mxu0  ;;  %v3001_v24 = vand.u32 4294901760, %v7467_v46  ;;  %v3084_v4 = vand.u32 4294901760, %v3083_v52  ;;  %v3091_v41 = vand.u32 4294901760, %v3090_v51 }
 0x1a1   : > { %v4044_v2 = vadd.f32 %v4043_v53, %v4042_v49  ;;  %5309 = vmatpush3.bf16.msra.mxu0 %v7389_v29  ;;  %v3210_v15 = vand.u32 4294901760, %v3209_v17  ;;  %v8134_v58 = vand.u32 4294901760, %v7452_v25  ;;  %v3104_v22 = vsub.f32 %v7454_v50, %v3103_v13 }
 0x1a2   : > { %5333 = vmatpush3.bf16.msra.mxu1 %v5332_v5  ;;  %5311 = vmatprep.subr.bf16.mxu0 %v7413_v34  ;;  %v7911_v38 = vand.u32 4294901760, %v7484_v3  ;;  %v7912_v37 = vand.u32 4294901760, %v7487_v20  ;;  %v3217_v10 = vand.u32 4294901760, %v3216_v19  ;;  %v3223_v5 = vsub.f32 %v7460_v14, %v7913_v63 }
 0x1a3   : > { %v3097_v11 = vsub.f32 %v7452_v25, %v8134_v58  ;;  %v1066_v28 = vadd.f32 %v4044_v2, %v7348_v35  ;;  %5335 = vmatprep.subr.bf16.mxu1 %v5334_v57  ;;  %v8135_v42 = vand.u32 4294901760, %v7463_v59  ;;  %v3002_v51 = vsub.f32 %v7467_v46, %v3001_v24 }
 0x1a4   : > { %v7520_v17 = vpack.c.bf16 %v2943_v55, %v2940_v61  ;;  %v5340_v49 = vpack.c.bf16 %v3091_v41, %v3084_v4  ;;  %v5350_v35 = vpack.c.bf16 %v7123_v12, %v7116_v8  ;;  %v3105_v57 = vand.u32 4294901760, %v3104_v22 }
 0x1a5   : > { %v3230_v52 = vsub.f32 %v7463_v59, %v8135_v42  ;;  %5313 = vmatpush3.bf16.msra.mxu0 %v7470_v33  ;;  %v3098_v2 = vand.u32 4294901760, %v3097_v11  ;;  %v3111_v19 = vsub.f32 %v7484_v3, %v7911_v38  ;;  %v3118_v53 = vsub.f32 %v7487_v20, %v7912_v37 }
 0x1a6   : > { %5337 = vmatpush3.bf16.msra.mxu1 %v5336_v32  ;;  %5315 = vmatprep.subr.bf16.mxu0 %v7496_v45  ;;  %v5342_v55 = vpack.c.bf16 %v3217_v10, %v3210_v15  ;;  %v3224_v61 = vand.u32 4294901760, %v3223_v5  ;;  %v3003_v58 = vand.u32 4294901760, %v3002_v51  ;;  %v5352_v11 = vpack.c.bf16 %v7146_v60, %v7136_v18 }
 0x1a7   : > { %5339 = vmatprep.subr.bf16.mxu1 %v5338_v62  ;;  %v3231_v4 = vand.u32 4294901760, %v3230_v52  ;;  %v5354_v32 = vpack.c.bf16 %v7195_v48, %v7180_v21  ;;  %v5344_v38 = vpack.c.bf16 %v3105_v57, %v3098_v2  ;;  %v3112_v37 = vand.u32 4294901760, %v3111_v19  ;;  %v8139_v57 = vld [vmem:[#allocation16_spill] sm:$0xff] }
 0x1a8   : > { %v4077_v41 = vpop.f32.mrb[4].mxu1  ;;  %v3119_v62 = vand.u32 4294901760, %v3118_v53  ;;  %v5356_v5 = vpack.c.bf16 %v7227_v43, %v7219_v1  ;;  %v5358_v51 = vpack.c.bf16 %v7265_v27, %v7253_v54  ;;  %v5366_v19 = vpack.c.bf16 %v7341_v9, %v7327_v26  ;;  %v8140_v53 = vld [vmem:[#allocation21_spill] sm:$0xff] }
 0x1a9   : > { %v4078_v42 = vpop.f32.mrb[5].mxu1  ;;  %5317 = vmatpush3.bf16.msra.mxu0 %v7520_v17  ;;  %v5346_v15 = vpack.c.bf16 %v3231_v4, %v3224_v61  ;;  %v5368_v61 = vpack.c.bf16 %v7374_v40, %v7352_v56  ;;  %v5370_v4 = vpack.c.bf16 %v7381_v47, %v7379_v30 }
 0x1aa   : > { %v4079_v22 = vadd.f32 %v4078_v42, %v4077_v41  ;;  %5341 = vmatpush3.bf16.msra.mxu1 %v5340_v49  ;;  %5351 = vmatprep.subr.bf16.mxu0 %v5350_v35  ;;  %v5348_v52 = vpack.c.bf16 %v3119_v62, %v3112_v37  ;;  %v5360_v49 = vpack.c.bf16 %v7276_v36, %v7274_v23  ;;  %v8136_v35 = vld [vmem:[#allocation11_spill] sm:$0xff]  ;;  %v8138_v37 = vld [vmem:[#allocation17_spill] sm:$0xff]  ;;  %v8146_v62 = vld [vmem:[#allocation22_spill] sm:$0xff] }
 0x1ab   : > { %5343 = vmatprep.subr.bf16.mxu1 %v5342_v55  ;;  %v8141_v55 = vand.u32 4294901760, %v7256_v31  ;;  %v8142_v41 = vld [vmem:[#allocation19_spill] sm:$0xff] }
 0x1ac   : > { %v1170_v10 = vadd.f32 %v4079_v22, %v1066_v28  ;;  %3004 = vmatmul.mubr.f32.vlgmr.msra.gmra.mrb[18].mxu0 %v3003_v58  ;;  %v5362_v28 = vpack.c.bf16 %v7300_v16, %v7298_v39  ;;  %v8143_v58 = vld [vmem:[#allocation24_spill] sm:$0xff] }
 0x1ad   : > { %5353 = vmatpush3.bf16.msra.mxu0 %v5352_v11  ;;  %3371 = vmatprep.mubr.f32.mxu0 %v7256_v31  ;;  %v5372_v42 = vpack.c.bf16 %v8143_v58, %v7392_v6  ;;  %v8144_v11 = vld [vmem:[#allocation20_spill] sm:$0xff]  ;;  %v8145_v31 = vld [vmem:[#allocation25_spill] sm:$0xff] }
 0x1ae   : > { %5345 = vmatpush3.bf16.msra.mxu1 %v5344_v38  ;;  %5355 = vmatprep.subr.bf16.mxu0 %v5354_v32  ;;  %v8137_v38 = vld [vmem:[#allocation15_spill] sm:$0xff]  ;;  %v5374_v32 = vpack.c.bf16 %v7421_v0, %v8145_v31 }
 0x1af   : > { %5347 = vmatprep.subr.bf16.mxu1 %v5346_v15  ;;  %v5364_v2 = vpack.c.bf16 %v8138_v37, %v8137_v38 }
 0x1b1   : > { %5357 = vmatpush3.bf16.msra.mxu0 %v5356_v5 }
 0x1b2   : > { %5349 = vmatpush3.bf16.msra.mxu1 %v5348_v52  ;;  %5359 = vmatprep.subr.bf16.mxu0 %v5358_v51  ;;  %v5376_v52 = vpack.c.bf16 %v7454_v50, %v7452_v25  ;;  %v8147_v51 = vld [vmem:[#allocation14_spill] sm:$0xff] }
 0x1b3   : > { %5383 = vmatprep.subr.bf16.mxu1 %v8136_v35 }
 0x1b5   : > { %3236 = vmatmul.mubr.f32.vlgmr.msra.gmra.mrb[18].mxu1 %v7444_v44  ;;  %5361 = vmatpush3.bf16.msra.mxu0 %v5360_v49  ;;  %v5378_v49 = vpack.c.bf16 %v7463_v59, %v7460_v14 }
 0x1b6   : > { %5385 = vmatpush3.bf16.msra.mxu1 %v8139_v57  ;;  %5363 = vmatprep.subr.bf16.mxu0 %v5362_v28 }
 0x1b7   : > { %5387 = vmatprep.subr.bf16.mxu1 %v8140_v53  ;;  %3478 = vmatprep.mubr.f32.mxu1 %v8141_v55  ;;  %v8149_v55 = vld [vmem:[#allocation12_spill] sm:$0xff] }
 0x1b9   : > { %5365 = vmatpush3.bf16.msra.mxu0 %v5364_v2  ;;  %v8148_v2 = vld [vmem:[#allocation18_spill] sm:$0xff] }
 0x1ba   : > { %5389 = vmatpush3.bf16.msra.mxu1 %v7249_v7  ;;  %5367 = vmatprep.subr.bf16.mxu0 %v5366_v19  ;;  %v5380_v19 = vpack.c.bf16 %v7487_v20, %v7484_v3 }
 0x1bb   : > { %5391 = vmatprep.subr.bf16.mxu1 %v8142_v41 }
 0x1bd   : > { %5369 = vmatpush3.bf16.msra.mxu0 %v5368_v61  ;;  %v8150_v61 = vand.u32 4294901760, %v7116_v8  ;;  %v8156_v8 = vand.u32 4294901760, %v7195_v48  ;;  %v8161_v48 = vand.u32 4294901760, %v7265_v27  ;;  %v8167_v27 = vand.u32 4294901760, %v8138_v37 }
 0x1be   : > { %5393 = vmatpush3.bf16.msra.mxu1 %v8144_v11  ;;  %5371 = vmatprep.subr.bf16.mxu0 %v5370_v4  ;;  %v8151_v4 = vand.u32 4294901760, %v7123_v12 }
 0x1bf   : > { %v4112_v22 = vpop.f32.mrb[6].mxu0  ;;  %5395 = vmatprep.subr.bf16.mxu1 %v8146_v62 }
 0x1c0   : > { %v4113_v15 = vpop.f32.mrb[7].mxu0 }
 0x1c1   : > { %v4114_v5 = vadd.f32 %v4113_v15, %v4112_v22  ;;  %5373 = vmatpush3.bf16.msra.mxu0 %v5372_v42  ;;  %v5414_v42 = vpack.c.bf16 %v8151_v4, %v8150_v61  ;;  %v8152_v22 = vld [vmem:[#allocation23_spill] sm:$0xff]  ;;  %v8159_v4 = vld [vmem:[#allocation13_spill] sm:$0xff] }
 0x1c2   : > { %5397 = vmatpush3.bf16.msra.mxu1 %v8147_v51  ;;  %5375 = vmatprep.subr.bf16.mxu0 %v5374_v32 }
 0x1c3   : > { %v1282_v28 = vadd.f32 %v4114_v5, %v1170_v10  ;;  %5399 = vmatprep.subr.bf16.mxu1 %v8148_v2  ;;  %v8153_v10 = vand.u32 4294901760, %v7136_v18  ;;  %v8154_v5 = vand.u32 4294901760, %v7146_v60  ;;  %v8157_v18 = vand.u32 4294901760, %v7219_v1 }
 0x1c4   : > { %v8158_v60 = vand.u32 4294901760, %v7227_v43  ;;  %v8163_v1 = vand.u32 4294901760, %v7276_v36  ;;  %v8164_v43 = vand.u32 4294901760, %v7298_v39  ;;  %v8168_v36 = vand.u32 4294901760, %v7327_v26 }
 0x1c5   : > { %5377 = vmatpush3.bf16.msra.mxu0 %v5376_v52  ;;  %v5416_v52 = vpack.c.bf16 %v8154_v5, %v8153_v10  ;;  %v8169_v39 = vand.u32 4294901760, %v7341_v9  ;;  %v8173_v26 = vand.u32 4294901760, %v7381_v47  ;;  %v8174_v9 = vand.u32 4294901760, %v7392_v6 }
 0x1c6   : > { %5401 = vmatpush3.bf16.msra.mxu1 %v8149_v55  ;;  %5379 = vmatprep.subr.bf16.mxu0 %v5378_v49  ;;  %v8155_v49 = vand.u32 4294901760, %v7180_v21  ;;  %v8160_v21 = vand.u32 4294901760, %v7253_v54  ;;  %v8166_v54 = vand.u32 4294901760, %v8137_v38  ;;  %v8172_v38 = vand.u32 4294901760, %v7379_v30 }
 0x1c7   : > { %5403 = vmatprep.subr.bf16.mxu1 %v8152_v22  ;;  %v8182_v5 = vand.u32 4294901760, %v7487_v20 }
 0x1c8   : > { %v4147_v32 = vpop.f32.mrb[6].mxu1  ;;  %v5418_v12 = vpack.c.bf16 %v8156_v8, %v8155_v49  ;;  %v5434_v37 = vpack.c.bf16 %v8173_v26, %v8172_v38 }
 0x1c9   : > { %v4148_v15 = vpop.f32.mrb[7].mxu1  ;;  %5381 = vmatpush3.bf16.msra.mxu0 %v5380_v19  ;;  %v5420_v19 = vpack.c.bf16 %v8158_v60, %v8157_v18 }
 0x1ca   : > { %v4149_v63 = vadd.f32 %v4148_v15, %v4147_v32  ;;  %5405 = vmatpush3.bf16.msra.mxu1 %v7389_v29  ;;  %5415 = vmatprep.subr.bf16.mxu0 %v5414_v42  ;;  %v5422_v42 = vpack.c.bf16 %v8161_v48, %v8160_v21  ;;  %v8165_v32 = vand.u32 4294901760, %v7300_v16  ;;  %v5430_v16 = vpack.c.bf16 %v8169_v39, %v8168_v36 }
 0x1cb   : > { %5407 = vmatprep.subr.bf16.mxu1 %v7413_v34 }
 0x1cc   : > { %v1514_v61 = vadd.f32 %v4149_v63, %v1282_v28  ;;  %3374 = vmatmul.mubr.f32.vlgmr.msra.gmra.mrb[20].mxu0 %v7467_v46  ;;  %v8162_v63 = vand.u32 4294901760, %v7274_v23  ;;  %v5426_v15 = vpack.c.bf16 %v8165_v32, %v8164_v43  ;;  %v5428_v23 = vpack.c.bf16 %v8167_v27, %v8166_v54 }
 0x1cd   : > { %5417 = vmatpush3.bf16.msra.mxu0 %v5416_v52  ;;  %3648 = vmatprep.mubr.f32.mxu0 %v8159_v4  ;;  %v8170_v46 = vand.u32 4294901760, %v7352_v56  ;;  %v8176_v56 = vand.u32 4294901760, %v8145_v31 }
 0x1ce   : > { %5409 = vmatpush3.bf16.msra.mxu1 %v7470_v33  ;;  %5419 = vmatprep.subr.bf16.mxu0 %v5418_v12  ;;  %v5424_v28 = vpack.c.bf16 %v8163_v1, %v8162_v63 }
 0x1cf   : > { %5411 = vmatprep.subr.bf16.mxu1 %v7496_v45 }
 0x1d1   : > { %5421 = vmatpush3.bf16.msra.mxu0 %v5420_v19 }
 0x1d2   : > { %5413 = vmatpush3.bf16.msra.mxu1 %v7520_v17  ;;  %5423 = vmatprep.subr.bf16.mxu0 %v5422_v42 }
 0x1d3   : > { %5447 = vmatprep.subr.bf16.mxu1 %v8136_v35 }
 0x1d5   : > { %3482 = vmatmul.mubr.f32.vlgmr.msra.gmra.mrb[20].mxu1 %v3001_v24  ;;  %5425 = vmatpush3.bf16.msra.mxu0 %v5424_v28  ;;  %v8171_v24 = vand.u32 4294901760, %v7374_v40 }
 0x1d6   : > { %5449 = vmatpush3.bf16.msra.mxu1 %v8139_v57  ;;  %5427 = vmatprep.subr.bf16.mxu0 %v5426_v15  ;;  %v8175_v57 = vand.u32 4294901760, %v8143_v58  ;;  %v8179_v58 = vand.u32 4294901760, %v7460_v14 }
 0x1d7   : > { %5451 = vmatprep.subr.bf16.mxu1 %v8140_v53  ;;  %3752 = vmatprep.mubr.f32.mxu1 %v8159_v4  ;;  %v5432_v35 = vpack.c.bf16 %v8171_v24, %v8170_v46 }
 0x1d8   : > { %v5436_v53 = vpack.c.bf16 %v8175_v57, %v8174_v9 }
 0x1d9   : > { %5429 = vmatpush3.bf16.msra.mxu0 %v5428_v23 }
 0x1da   : > { %5453 = vmatpush3.bf16.msra.mxu1 %v7249_v7  ;;  %5431 = vmatprep.subr.bf16.mxu0 %v5430_v16  ;;  %v8177_v7 = vand.u32 4294901760, %v7421_v0 }
 0x1db   : > { %5455 = vmatprep.subr.bf16.mxu1 %v8142_v41  ;;  %v8178_v41 = vand.u32 4294901760, %v7452_v25 }
 0x1dc   : > { %v5438_v40 = vpack.c.bf16 %v8177_v7, %v8176_v56 }
 0x1dd   : > { %5433 = vmatpush3.bf16.msra.mxu0 %v5432_v35  ;;  %v5440_v6 = vpack.c.bf16 %v3103_v13, %v8178_v41 }
 0x1de   : > { %5457 = vmatpush3.bf16.msra.mxu1 %v8144_v11  ;;  %5435 = vmatprep.subr.bf16.mxu0 %v5434_v37  ;;  %v8180_v11 = vand.u32 4294901760, %v7463_v59 }
 0x1df   : > { %v4182_v30 = vpop.f32.mrb[8].mxu0  ;;  %5459 = vmatprep.subr.bf16.mxu1 %v8146_v62  ;;  %v8181_v62 = vand.u32 4294901760, %v7484_v3 }
 0x1e0   : > { %v4183_v47 = vpop.f32.mrb[9].mxu0  ;;  %v5442_v0 = vpack.c.bf16 %v8180_v11, %v8179_v58 }
 0x1e1   : > { %v4184_v10 = vadd.f32 %v4183_v47, %v4182_v30  ;;  %5437 = vmatpush3.bf16.msra.mxu0 %v5436_v53  ;;  %v5444_v25 = vpack.c.bf16 %v8182_v5, %v8181_v62 }
 0x1e2   : > { %5461 = vmatpush3.bf16.msra.mxu1 %v8147_v51  ;;  %5439 = vmatprep.subr.bf16.mxu0 %v5438_v40 }
 0x1e3   : > { %v1652_v31 = vadd.f32 %v4184_v10, %v1514_v61  ;;  %5463 = vmatprep.subr.bf16.mxu1 %v8148_v2 }
 0x1e5   : > { %5441 = vmatpush3.bf16.msra.mxu0 %v5440_v6 }
 0x1e6   : > { %5465 = vmatpush3.bf16.msra.mxu1 %v8149_v55  ;;  %5443 = vmatprep.subr.bf16.mxu0 %v5442_v0 }
 0x1e7   : > { %5467 = vmatprep.subr.bf16.mxu1 %v8152_v22 }
 0x1e8   : > { %v4217_v50 = vpop.f32.mrb[8].mxu1 }
 0x1e9   : > { %v4218_v13 = vpop.f32.mrb[9].mxu1  ;;  %5445 = vmatpush3.bf16.msra.mxu0 %v5444_v25 }
 0x1ea   : > { %v4219_v14 = vadd.f32 %v4218_v13, %v4217_v50  ;;  %5469 = vmatpush3.bf16.msra.mxu1 %v7389_v29 }
 0x1eb   : > { %5471 = vmatprep.subr.bf16.mxu1 %v7413_v34 }
 0x1ec   : > { %v1760_v59 = vadd.f32 %v4219_v14, %v1652_v31  ;;  %3650 = vmatmul.mubr.f32.vlgmr.msra.gmra.mrb[22].mxu0 %v7444_v44 }
 0x1ee   : > { %5473 = vmatpush3.bf16.msra.mxu1 %v7470_v33 }
 0x1ef   : > { %5475 = vmatprep.subr.bf16.mxu1 %v7496_v45 }
 0x1f2   : > { %5477 = vmatpush3.bf16.msra.mxu1 %v7520_v17 }
 0x1f5   : > { %3754 = vmatmul.mubr.f32.vlgmr.msra.gmra.mrb[22].mxu1 %v7444_v44 }
 0x1ff   : > { %v4252_v3 = vpop.f32.mrb[10].mxu0 }
 0x200   : > { %v4253_v20 = vpop.f32.mrb[11].mxu0 }
 0x201   : > { %v4254_v51 = vadd.f32 %v4253_v20, %v4252_v3 }
 0x203   : > { %v1928_v2 = vadd.f32 %v4254_v51, %v1760_v59 }
 0x208   : > { %v4287_v55 = vpop.f32.mrb[10].mxu1 }
 0x209   : > { %v4288_v22 = vpop.f32.mrb[11].mxu1 }
 0x20a   : > { %v4289_v29 = vadd.f32 %v4288_v22, %v4287_v55 }
 0x20c   : > { %v2032_v52 = vadd.f32 %v4289_v29, %v1928_v2 }
 0x21f   : > { %v4322_v34 = vpop.f32.mrb[12].mxu0 }
 0x220   : > { %v4323_v49 = vpop.f32.mrb[13].mxu0 }
 0x221   : > { %v4324_v8 = vadd.f32 %v4323_v49, %v4322_v34 }
 0x223   : > { %v2144_v12 = vadd.f32 %v4324_v8, %v2032_v52 }
 0x228   : > { %v4357_v61 = vpop.f32.mrb[12].mxu1 }
 0x229   : > { %v4358_v33 = vpop.f32.mrb[13].mxu1 }
 0x22a   : > { %v4359_v18 = vadd.f32 %v4358_v33, %v4357_v61 }
 0x22c   : > { %v2376_v45 = vadd.f32 %v4359_v18, %v2144_v12 }
 0x23f   : > { %v4392_v60 = vpop.f32.mrb[14].mxu0 }
 0x240   : > { %v4393_v17 = vpop.f32.mrb[15].mxu0 }
 0x241   : > { %v4394_v19 = vadd.f32 %v4393_v17, %v4392_v60 }
 0x243   : > { %v2514_v44 = vadd.f32 %v4394_v19, %v2376_v45 }
 0x248   : > { %v4427_v4 = vpop.f32.mrb[14].mxu1 }
 0x249   : > { %v4428_v21 = vpop.f32.mrb[15].mxu1 }
 0x24a   : > { %v4429_v48 = vadd.f32 %v4428_v21, %v4427_v4 }
 0x24c   : > { %v2622_v42 = vadd.f32 %v4429_v48, %v2514_v44 }
 0x25f   : > { %v4462_v63 = vpop.f32.mrb[16].mxu0 }
 0x260   : > { %v4463_v1 = vpop.f32.mrb[17].mxu0 }
 0x261   : > { %v4464_v28 = vadd.f32 %v4463_v1, %v4462_v63 }
 0x263   : > { %v2790_v43 = vadd.f32 %v4464_v28, %v2622_v42 }
 0x268   : > { %v4497_v32 = vpop.f32.mrb[16].mxu1 }
 0x269   : > { %v4498_v15 = vpop.f32.mrb[17].mxu1 }
 0x26a   : > { %v4499_v54 = vadd.f32 %v4498_v15, %v4497_v32 }
 0x26c   : > { %v2894_v27 = vadd.f32 %v4499_v54, %v2790_v43 }
 0x27f   : > { %v4532_v23 = vpop.f32.mrb[18].mxu0 }
 0x280   : > { %v4533_v36 = vpop.f32.mrb[19].mxu0 }
 0x281   : > { %v4534_v39 = vadd.f32 %v4533_v36, %v4532_v23 }
 0x283   : > { %v3006_v16 = vadd.f32 %v4534_v39, %v2894_v27 }
 0x288   : > { %v4567_v46 = vpop.f32.mrb[18].mxu1 }
 0x289   : > { %v4568_v24 = vpop.f32.mrb[19].mxu1 }
 0x28a   : > { %v4569_v35 = vadd.f32 %v4568_v24, %v4567_v46 }
 0x28c   : > { %v3238_v38 = vadd.f32 %v4569_v35, %v3006_v16 }
 0x29f   : > { %v4602_v26 = vpop.f32.mrb[20].mxu0 }
 0x2a0   : > { %v4603_v37 = vpop.f32.mrb[21].mxu0 }
 0x2a1   : > { %v4604_v9 = vadd.f32 %v4603_v37, %v4602_v26 }
 0x2a3   : > { %v3376_v57 = vadd.f32 %v4604_v9, %v3238_v38 }
 0x2a8   : > { %v4637_v53 = vpop.f32.mrb[20].mxu1 }
 0x2a9   : > { %v4638_v56 = vpop.f32.mrb[21].mxu1 }
 0x2aa   : > { %v4639_v7 = vadd.f32 %v4638_v56, %v4637_v53 }
 0x2ac   : > { %v3484_v40 = vadd.f32 %v4639_v7, %v3376_v57 }
 0x2bf   : > { %v4672_v30 = vpop.f32.mrb[22].mxu0 }
 0x2c0   : > { %v4673_v47 = vpop.f32.mrb[23].mxu0 }
 0x2c1   : > { %v4674_v10 = vadd.f32 %v4673_v47, %v4672_v30 }
 0x2c3   : > { %v3652_v41 = vadd.f32 %v4674_v10, %v3484_v40 }
 0x2c8   : > { %v4707_v6 = vpop.f32.mrb[22].mxu1 }
 0x2c9   : > { %v4708_v58 = vpop.f32.mrb[23].mxu1 }
 0x2ca   : > { %v4709_v11 = vadd.f32 %v4708_v58, %v4707_v6 }
 0x2cc   : > { %v3756_v0 = vadd.f32 %v4709_v11, %v3652_v41 }
 0x2ce   : > { %3759 = vst [vmem:[%s174_s27] sm:$0xff] %v3756_v0 }
 0x2cf   : > { %5608 = shalt.err (!%p5605_p7)
}
 0x2d0   : > { %s5609_s7 = scalar_lea.hbm %s7674_s30, 128  ;;  %s5613_s25 = scalar_lea.hbm %s7720_s2, 256 }
 0x2d1   : > { %p5610_p9 = scmp.ne.s32.totalorder %s7674_s30, %s5609_s7  ;;  %p5614_p0 = scmp.lt.u32.totalorder %s7674_s30, %s7720_s2 }
 0x2d2   : > { %p5615_p11 = scmp.lt.u32.totalorder %s5613_s25, %s5609_s7  ;;  %p5617_p4 = scmp.lt.u32.totalorder %s5609_s7, %s7674_s30 }
 0x2d3   : > { %p5611_p2 = pnand %p5610_p9, %p5778_p12 }
 0x2d4   : > { %p5616_p1 = por %p5615_p11, %p5614_p0 }
 0x2d5   : > { %p5612_p5 = pneg %p5611_p2 }
 0x2d6   : > { %p5618_p6 = por %p5617_p4, %p5616_p1 }
 0x2d8   : > { %p5619_p8 = pnand %p5618_p6, %p5612_p5 }
 0x2da   : > { %5622 = shalt.err (!%p5619_p8)
}
 0x2db   : > { %5484 = dma.vmem_to_hbm [thread:$0]  (%p5778_p12), %s7676_s22, 128, %s7674_s30, %s3761_s3  }
 0x2dc PF: > { %s3786_s19 = sand.u32 1, %s5653_s9   ;;  %p8183_p10 = scmp.ne.s32.totalorder %s7915_s16, 0 }
 0x2dd   : > { %p8184_p13 = scmp.ge.s32.totalorder %s5665_s12, 2  ;;  %s3787_s29 = scalar_lea.sflag [#allocation4], %s3786_s19 }
 0x2df   : > { %p5495_p3 = pnand %p8184_p13, %p8183_p10 }
 0x2e1   : > { %5648 = dma.done.wait (!%p5495_p3), %s3787_s29, 128  }
 0x2e2   : > { %5650 = vsyncadd (!%p5495_p3), %s3787_s29, 4294967168  ;;  %p16_p7 = scmp.ge.s32.totalorder %s5743_s21, 4   ;;  %s8185_s9 = smov %s5657_s10 }
 0x2e3   : > { %s8186_s10 = smov %s5661_s11  ;;  %s8187_s11 = smov %s5774_s8 }
 0x2e4   : > { %s8188_s12 = smov %s5743_s21  ;;  %18 = sbr.rel (!%p16_p7) target bundleno = 6 (0x6), region = 77 }
 0x2eb   :  { %3792 = vsyncpa [#allocation3], 1 }
 0x2ec   :  { %3794 = vsyncpa [#allocation3 + $0x1], 1 }
 0x2ed   :  { %3795 = vsyncpa [#allocation6], 1 }
 0x2ee   :  { %3796 = vsyncpa [#allocation4], 1 }
 0x2ef   :  { %3798 = vsyncpa [#allocation4 + $0x1], 1 }

</bundles_post_ra>
